<compile_context>
chip_gen: v6e
topology: v6e:2x2x1
jax: 0.10.0
libtpu: 0.0.40
codegen_flags: <defaults>
</compile_context>

<pallas_src>
import jax
import jax.numpy as jnp
from jax.experimental import pallas as pl

# ---------------- model dimensions (small, synthetic) ----------------
B, S, H = 2, 8, 32          # batch, seq length, hidden
NH, DH = 2, 16              # heads, head dim (NH * DH == H)
F = 64                      # FFN inner dim
VOCAB = 100
NLAYERS = 2
NUM_LABELS = 2
LOGIT_PAD = 128             # lane-dense padded logits width (>= NUM_LABELS)
BS = B * S
EPS = 1e-12


def _layernorm2d(x, g, b):
    mu = jnp.mean(x, axis=-1, keepdims=True)
    var = jnp.mean((x - mu) ** 2, axis=-1, keepdims=True)
    return (x - mu) * jax.lax.rsqrt(var + EPS) * g + b


# ---------------- fused whole-model kernel (single block, no grid) ----------
def _model_kernel(x_ref, mbias_ref,
                  wqkv_ref, bqkv_ref, wo_ref, bo_ref, ln_ref,
                  w1_ref, b1_ref, w2_ref, b2_ref,
                  ws_ref, bs_ref, wc_ref, bc_ref,
                  o_ref):
    x2 = x_ref[...]                      # (B*S, H) activations, whole batch
    mbias = mbias_ref[...]               # (B, S, S) additive attention bias
    scale = 1.0 / (DH ** 0.5)

    for li in range(NLAYERS):            # static loop over stacked layers
        # fused QKV projection: one (B*S, H) x (H, 3H) MXU push
        qkv = jnp.dot(x2, wqkv_ref[li],
                      preferred_element_type=jnp.float32) + bqkv_ref[li]
        q = qkv[:, 0:H].reshape(B, S, H)
        k = qkv[:, H:2 * H].reshape(B, S, H)
        v = qkv[:, 2 * H:3 * H].reshape(B, S, H)

        wo = wo_ref[li]                  # (H, H)
        attn = jnp.zeros((BS, H), jnp.float32)
        for h in range(NH):              # tiny static head loop (NH == 2)
            sl = slice(h * DH, (h + 1) * DH)
            s = jnp.einsum('bqd,bkd->bqk', q[..., sl], k[..., sl],
                           preferred_element_type=jnp.float32) * scale + mbias
            s = s - jnp.max(s, axis=-1, keepdims=True)
            p = jnp.exp(s)
            p = p * pl.reciprocal(jnp.sum(p, axis=-1, keepdims=True),
                                  approx=True)
            ctx = jnp.einsum('bqk,bkd->bqd', p, v[..., sl],
                             preferred_element_type=jnp.float32)   # (B, S, DH)
            attn = attn + jnp.dot(ctx.reshape(BS, DH), wo[sl, :],
                                  preferred_element_type=jnp.float32)
        attn = attn + bo_ref[li]

        ln = ln_ref[li]                  # (4, H): ln1_g, ln1_b, ln2_g, ln2_b
        h1 = _layernorm2d(x2 + attn, ln[0:1, :], ln[1:2, :])

        ff = jnp.dot(h1, w1_ref[li],
                     preferred_element_type=jnp.float32) + b1_ref[li]
        ff = jax.nn.gelu(ff, approximate=True)
        ff = jnp.dot(ff, w2_ref[li],
                     preferred_element_type=jnp.float32) + b2_ref[li]

        x2 = _layernorm2d(h1 + ff, ln[2:3, :], ln[3:4, :])

    # sequence summary (XLNet summary_type='last'): static last-token slice
    h_last = x2.reshape(B, S, H)[:, S - 1:S, :].reshape(B, H)        # (B, H)
    summ = jnp.tanh(jnp.dot(h_last, ws_ref[...],
                            preferred_element_type=jnp.float32) + bs_ref[...])
    # classifier head, written lane-dense (padded to LOGIT_PAD lanes)
    o_ref[...] = jnp.dot(summ, wc_ref[...],
                         preferred_element_type=jnp.float32) + bc_ref[...]


# ---------------- parameter init (deterministic, packed) ----------------
def init_params(key):
    f32 = jnp.float32

    def norm(k, shape, scale=0.02):
        return scale * jax.random.normal(k, shape, dtype=f32)

    keys = jax.random.split(key, 3 + NLAYERS)
    params = {"emb": norm(keys[0], (VOCAB, H))}

    wqkv, wo, w1, w2 = [], [], [], []
    for li in range(NLAYERS):
        lk = jax.random.split(keys[3 + li], 4)
        wqkv.append(norm(lk[0], (H, 3 * H)))
        wo.append(norm(lk[1], (H, H)))
        w1.append(norm(lk[2], (H, F)))
        w2.append(norm(lk[3], (F, H)))

    ln_one_layer = jnp.stack([jnp.ones((H,), f32), jnp.zeros((H,), f32),
                              jnp.ones((H,), f32), jnp.zeros((H,), f32)])
    params.update({
        "wqkv": jnp.stack(wqkv), "bqkv": jnp.zeros((NLAYERS, 1, 3 * H), f32),
        "wo": jnp.stack(wo), "bo": jnp.zeros((NLAYERS, 1, H), f32),
        "ln": jnp.tile(ln_one_layer[None], (NLAYERS, 1, 1)),        # (L, 4, H)
        "w1": jnp.stack(w1), "b1": jnp.zeros((NLAYERS, 1, F), f32),
        "w2": jnp.stack(w2), "b2": jnp.zeros((NLAYERS, 1, H), f32),
        "ws": norm(keys[1], (H, H)), "bs": jnp.zeros((1, H), f32),
    })
    # classifier weights zero-padded to a lane-dense width (math-identical)
    wc = norm(keys[2], (H, NUM_LABELS))
    params["wc"] = jnp.zeros((H, LOGIT_PAD), f32).at[:, :NUM_LABELS].set(wc)
    params["bc"] = jnp.zeros((1, LOGIT_PAD), f32)
    return params


# ---------------- forward (mirrors Text_Splice_Finetune.forward) ------------
@jax.jit
def text_splice_finetune_forward(params, txt, attention_mask=None):
    """txt: [B, S] int32 token ids -> logits [B, NUM_LABELS] float32."""
    if attention_mask is None:
        attention_mask = jnp.ones((B, S), jnp.float32)
    # additive mask bias: 0 for keep, -1e9 for masked keys, broadcast to (B,S,S)
    bias = (attention_mask.astype(jnp.float32) - 1.0) * 1e9
    mask_bias = jnp.broadcast_to(bias.reshape(B, 1, S), (B, S, S))

    # embedding gather stays in plain JAX (glue), then flatten batch*seq
    x = jnp.take(params["emb"], txt, axis=0).reshape(BS, H)

    logits_pad = pl.pallas_call(
        _model_kernel,
        out_shape=jax.ShapeDtypeStruct((B, LOGIT_PAD), jnp.float32),
    )(x, mask_bias,
      params["wqkv"], params["bqkv"], params["wo"], params["bo"], params["ln"],
      params["w1"], params["b1"], params["w2"], params["b2"],
      params["ws"], params["bs"], params["wc"], params["bc"])

    return logits_pad[:, :NUM_LABELS]


if __name__ == "__main__":
    key = jax.random.PRNGKey(0)
    k_param, k_txt = jax.random.split(key)
    params = init_params(k_param)

    txt = jax.random.randint(k_txt, (B, S), 0, VOCAB, dtype=jnp.int32)
    attention_mask = jnp.ones((B, S), jnp.float32).at[1, 0].set(0.0)

    logits = text_splice_finetune_forward(params, txt, attention_mask)
    jax.block_until_ready(logits)
    assert logits.shape == (B, NUM_LABELS) and logits.dtype == jnp.float32
    assert bool(jnp.all(jnp.isfinite(logits)))
    print("KERNEL_OK")
</pallas_src>

<mosaic_0001>
module attributes {stable_mosaic.version = 11 : i64} {
  func.func @_model_kernel(%arg0: memref<16x32xf32, #tpu.memory_space<vmem>>, %arg1: memref<2x8x8xf32, #tpu.memory_space<vmem>>, %arg2: memref<2x32x96xf32, #tpu.memory_space<vmem>>, %arg3: memref<2x1x96xf32, #tpu.memory_space<vmem>>, %arg4: memref<2x32x32xf32, #tpu.memory_space<vmem>>, %arg5: memref<2x1x32xf32, #tpu.memory_space<vmem>>, %arg6: memref<2x4x32xf32, #tpu.memory_space<vmem>>, %arg7: memref<2x32x64xf32, #tpu.memory_space<vmem>>, %arg8: memref<2x1x64xf32, #tpu.memory_space<vmem>>, %arg9: memref<2x64x32xf32, #tpu.memory_space<vmem>>, %arg10: memref<2x1x32xf32, #tpu.memory_space<vmem>>, %arg11: memref<32x32xf32, #tpu.memory_space<vmem>>, %arg12: memref<1x32xf32, #tpu.memory_space<vmem>>, %arg13: memref<32x128xf32, #tpu.memory_space<vmem>>, %arg14: memref<1x128xf32, #tpu.memory_space<vmem>>, %arg15: memref<2x128xf32, #tpu.memory_space<vmem>>) attributes {dimension_semantics = [], scalar_prefetch = 0 : i64, scratch_operands = 0 : i64, tpu.core_type = #tpu.core_type<tc>} {
    %c0 = arith.constant 0 : index
    %c0_0 = arith.constant 0 : index
    %0 = vector.load %arg0[%c0, %c0_0] : memref<16x32xf32, #tpu.memory_space<vmem>>, vector<16x32xf32>
    %c0_1 = arith.constant 0 : index
    %c0_2 = arith.constant 0 : index
    %c0_3 = arith.constant 0 : index
    %1 = vector.load %arg1[%c0_1, %c0_2, %c0_3] : memref<2x8x8xf32, #tpu.memory_space<vmem>>, vector<2x8x8xf32>
    %c0_4 = arith.constant 0 : index
    %c0_5 = arith.constant 0 : index
    %c0_6 = arith.constant 0 : index
    %2 = vector.load %arg2[%c0_4, %c0_5, %c0_6] : memref<2x32x96xf32, #tpu.memory_space<vmem>>, vector<1x32x96xf32>
    %3 = vector.shape_cast %2 : vector<1x32x96xf32> to vector<32x96xf32>
    %cst = arith.constant dense<0.000000e+00> : vector<16x96xf32>
    %4 = tpu.matmul %0, %3, %cst {dimension_numbers = #tpu.dot_dimension_numbers<[1], [0], [0], [1], [0, 0, 1, 1], [], []>} : vector<16x32xf32>, vector<32x96xf32>, vector<16x96xf32> -> vector<16x96xf32>
    %c0_7 = arith.constant 0 : index
    %c0_8 = arith.constant 0 : index
    %c0_9 = arith.constant 0 : index
    %5 = vector.load %arg3[%c0_7, %c0_8, %c0_9] : memref<2x1x96xf32, #tpu.memory_space<vmem>>, vector<1x1x96xf32>
    %6 = vector.shape_cast %5 : vector<1x1x96xf32> to vector<1x96xf32>
    %7 = vector.broadcast %6 : vector<1x96xf32> to vector<16x96xf32>
    %8 = arith.addf %4, %7 : vector<16x96xf32>
    %9 = vector.extract_strided_slice %8 {offsets = [0, 0], sizes = [16, 32], strides = [1, 1]} : vector<16x96xf32> to vector<16x32xf32>
    %10 = vector.shape_cast %9 : vector<16x32xf32> to vector<2x8x32xf32>
    %11 = vector.extract_strided_slice %8 {offsets = [0, 32], sizes = [16, 32], strides = [1, 1]} : vector<16x96xf32> to vector<16x32xf32>
    %12 = vector.shape_cast %11 : vector<16x32xf32> to vector<2x8x32xf32>
    %13 = vector.extract_strided_slice %8 {offsets = [0, 64], sizes = [16, 32], strides = [1, 1]} : vector<16x96xf32> to vector<16x32xf32>
    %14 = vector.shape_cast %13 : vector<16x32xf32> to vector<2x8x32xf32>
    %c0_10 = arith.constant 0 : index
    %c0_11 = arith.constant 0 : index
    %c0_12 = arith.constant 0 : index
    %15 = vector.load %arg4[%c0_10, %c0_11, %c0_12] : memref<2x32x32xf32, #tpu.memory_space<vmem>>, vector<1x32x32xf32>
    %16 = vector.shape_cast %15 : vector<1x32x32xf32> to vector<32x32xf32>
    %cst_13 = arith.constant 0.000000e+00 : f32
    %17 = vector.broadcast %cst_13 : f32 to vector<16x32xf32>
    %18 = vector.extract_strided_slice %10 {offsets = [0, 0, 0], sizes = [2, 8, 16], strides = [1, 1, 1]} : vector<2x8x32xf32> to vector<2x8x16xf32>
    %19 = vector.extract_strided_slice %12 {offsets = [0, 0, 0], sizes = [2, 8, 16], strides = [1, 1, 1]} : vector<2x8x32xf32> to vector<2x8x16xf32>
    "tpu.trace_start"() <{level = 10 : i32, message = "bqd,bkd->bqk"}> : () -> ()
    %cst_14 = arith.constant dense<0.000000e+00> : vector<2x8x8xf32>
    %20 = tpu.matmul %18, %19, %cst_14 {dimension_numbers = #tpu.dot_dimension_numbers<[2], [2], [1], [1], [0, 0, 0, 1, 1, 1], [0], [0]>} : vector<2x8x16xf32>, vector<2x8x16xf32>, vector<2x8x8xf32> -> vector<2x8x8xf32>
    "tpu.trace_stop"() : () -> ()
    %cst_15 = arith.constant 2.500000e-01 : f32
    %21 = vector.broadcast %cst_15 : f32 to vector<2x8x8xf32>
    %22 = arith.mulf %20, %21 : vector<2x8x8xf32>
    %23 = arith.addf %22, %1 : vector<2x8x8xf32>
    %cst_16 = arith.constant dense<0xFF800000> : vector<2x8xf32>
    %24 = vector.multi_reduction <maximumf>, %23, %cst_16 [2] : vector<2x8x8xf32> to vector<2x8xf32>
    %25 = vector.shape_cast %24 : vector<2x8xf32> to vector<2x8x1xf32>
    %26 = vector.broadcast %25 : vector<2x8x1xf32> to vector<2x8x8xf32>
    %27 = arith.subf %23, %26 : vector<2x8x8xf32>
    %28 = math.exp %27 : vector<2x8x8xf32>
    %cst_17 = arith.constant dense<0.000000e+00> : vector<2x8xf32>
    %29 = vector.multi_reduction <add>, %28, %cst_17 [2] : vector<2x8x8xf32> to vector<2x8xf32>
    %30 = vector.shape_cast %29 : vector<2x8xf32> to vector<2x8x1xf32>
    %31 = tpu.reciprocal %30 {approx = true} : vector<2x8x1xf32> -> vector<2x8x1xf32>
    %32 = vector.broadcast %31 : vector<2x8x1xf32> to vector<2x8x8xf32>
    %33 = arith.mulf %28, %32 : vector<2x8x8xf32>
    %34 = vector.extract_strided_slice %14 {offsets = [0, 0, 0], sizes = [2, 8, 16], strides = [1, 1, 1]} : vector<2x8x32xf32> to vector<2x8x16xf32>
    "tpu.trace_start"() <{level = 10 : i32, message = "bqk,bkd->bqd"}> : () -> ()
    %cst_18 = arith.constant dense<0.000000e+00> : vector<2x8x16xf32>
    %35 = tpu.matmul %33, %34, %cst_18 {dimension_numbers = #tpu.dot_dimension_numbers<[2], [1], [1], [2], [0, 0, 0, 1, 1, 2], [0], [0]>} : vector<2x8x8xf32>, vector<2x8x16xf32>, vector<2x8x16xf32> -> vector<2x8x16xf32>
    "tpu.trace_stop"() : () -> ()
    %36 = vector.shape_cast %35 : vector<2x8x16xf32> to vector<16x16xf32>
    %37 = vector.extract_strided_slice %16 {offsets = [0, 0], sizes = [16, 32], strides = [1, 1]} : vector<32x32xf32> to vector<16x32xf32>
    %cst_19 = arith.constant dense<0.000000e+00> : vector<16x32xf32>
    %38 = tpu.matmul %36, %37, %cst_19 {dimension_numbers = #tpu.dot_dimension_numbers<[1], [0], [0], [1], [0, 0, 1, 1], [], []>} : vector<16x16xf32>, vector<16x32xf32>, vector<16x32xf32> -> vector<16x32xf32>
    %39 = arith.addf %17, %38 : vector<16x32xf32>
    %40 = vector.extract_strided_slice %10 {offsets = [0, 0, 16], sizes = [2, 8, 16], strides = [1, 1, 1]} : vector<2x8x32xf32> to vector<2x8x16xf32>
    %41 = vector.extract_strided_slice %12 {offsets = [0, 0, 16], sizes = [2, 8, 16], strides = [1, 1, 1]} : vector<2x8x32xf32> to vector<2x8x16xf32>
    "tpu.trace_start"() <{level = 10 : i32, message = "bqd,bkd->bqk"}> : () -> ()
    %cst_20 = arith.constant dense<0.000000e+00> : vector<2x8x8xf32>
    %42 = tpu.matmul %40, %41, %cst_20 {dimension_numbers = #tpu.dot_dimension_numbers<[2], [2], [1], [1], [0, 0, 0, 1, 1, 1], [0], [0]>} : vector<2x8x16xf32>, vector<2x8x16xf32>, vector<2x8x8xf32> -> vector<2x8x8xf32>
    "tpu.trace_stop"() : () -> ()
    %cst_21 = arith.constant 2.500000e-01 : f32
    %43 = vector.broadcast %cst_21 : f32 to vector<2x8x8xf32>
    %44 = arith.mulf %42, %43 : vector<2x8x8xf32>
    %45 = arith.addf %44, %1 : vector<2x8x8xf32>
    %cst_22 = arith.constant dense<0xFF800000> : vector<2x8xf32>
    %46 = vector.multi_reduction <maximumf>, %45, %cst_22 [2] : vector<2x8x8xf32> to vector<2x8xf32>
    %47 = vector.shape_cast %46 : vector<2x8xf32> to vector<2x8x1xf32>
    %48 = vector.broadcast %47 : vector<2x8x1xf32> to vector<2x8x8xf32>
    %49 = arith.subf %45, %48 : vector<2x8x8xf32>
    %50 = math.exp %49 : vector<2x8x8xf32>
    %cst_23 = arith.constant dense<0.000000e+00> : vector<2x8xf32>
    %51 = vector.multi_reduction <add>, %50, %cst_23 [2] : vector<2x8x8xf32> to vector<2x8xf32>
    %52 = vector.shape_cast %51 : vector<2x8xf32> to vector<2x8x1xf32>
    %53 = tpu.reciprocal %52 {approx = true} : vector<2x8x1xf32> -> vector<2x8x1xf32>
    %54 = vector.broadcast %53 : vector<2x8x1xf32> to vector<2x8x8xf32>
    %55 = arith.mulf %50, %54 : vector<2x8x8xf32>
    %56 = vector.extract_strided_slice %14 {offsets = [0, 0, 16], sizes = [2, 8, 16], strides = [1, 1, 1]} : vector<2x8x32xf32> to vector<2x8x16xf32>
    "tpu.trace_start"() <{level = 10 : i32, message = "bqk,bkd->bqd"}> : () -> ()
    %cst_24 = arith.constant dense<0.000000e+00> : vector<2x8x16xf32>
    %57 = tpu.matmul %55, %56, %cst_24 {dimension_numbers = #tpu.dot_dimension_numbers<[2], [1], [1], [2], [0, 0, 0, 1, 1, 2], [0], [0]>} : vector<2x8x8xf32>, vector<2x8x16xf32>, vector<2x8x16xf32> -> vector<2x8x16xf32>
    "tpu.trace_stop"() : () -> ()
    %58 = vector.shape_cast %57 : vector<2x8x16xf32> to vector<16x16xf32>
    %59 = vector.extract_strided_slice %16 {offsets = [16, 0], sizes = [16, 32], strides = [1, 1]} : vector<32x32xf32> to vector<16x32xf32>
    %cst_25 = arith.constant dense<0.000000e+00> : vector<16x32xf32>
    %60 = tpu.matmul %58, %59, %cst_25 {dimension_numbers = #tpu.dot_dimension_numbers<[1], [0], [0], [1], [0, 0, 1, 1], [], []>} : vector<16x16xf32>, vector<16x32xf32>, vector<16x32xf32> -> vector<16x32xf32>
    %61 = arith.addf %39, %60 : vector<16x32xf32>
    %c0_26 = arith.constant 0 : index
    %c0_27 = arith.constant 0 : index
    %c0_28 = arith.constant 0 : index
    %62 = vector.load %arg5[%c0_26, %c0_27, %c0_28] : memref<2x1x32xf32, #tpu.memory_space<vmem>>, vector<1x1x32xf32>
    %63 = vector.shape_cast %62 : vector<1x1x32xf32> to vector<1x32xf32>
    %64 = vector.broadcast %63 : vector<1x32xf32> to vector<16x32xf32>
    %65 = arith.addf %61, %64 : vector<16x32xf32>
    %c0_29 = arith.constant 0 : index
    %c0_30 = arith.constant 0 : index
    %c0_31 = arith.constant 0 : index
    %66 = vector.load %arg6[%c0_29, %c0_30, %c0_31] : memref<2x4x32xf32, #tpu.memory_space<vmem>>, vector<1x4x32xf32>
    %67 = vector.shape_cast %66 : vector<1x4x32xf32> to vector<4x32xf32>
    %68 = arith.addf %0, %65 : vector<16x32xf32>
    %69 = vector.extract_strided_slice %67 {offsets = [0, 0], sizes = [1, 32], strides = [1, 1]} : vector<4x32xf32> to vector<1x32xf32>
    %70 = vector.extract_strided_slice %67 {offsets = [1, 0], sizes = [1, 32], strides = [1, 1]} : vector<4x32xf32> to vector<1x32xf32>
    %cst_32 = arith.constant dense<0.000000e+00> : vector<16xf32>
    %71 = vector.multi_reduction <add>, %68, %cst_32 [1] : vector<16x32xf32> to vector<16xf32>
    %72 = vector.shape_cast %71 : vector<16xf32> to vector<16x1xf32>
    %cst_33 = arith.constant 3.200000e+01 : f32
    %73 = vector.broadcast %cst_33 : f32 to vector<16x1xf32>
    %74 = arith.divf %72, %73 : vector<16x1xf32>
    %75 = vector.broadcast %74 : vector<16x1xf32> to vector<16x32xf32>
    %76 = arith.subf %68, %75 : vector<16x32xf32>
    %77 = arith.mulf %76, %76 : vector<16x32xf32>
    %cst_34 = arith.constant dense<0.000000e+00> : vector<16xf32>
    %78 = vector.multi_reduction <add>, %77, %cst_34 [1] : vector<16x32xf32> to vector<16xf32>
    %79 = vector.shape_cast %78 : vector<16xf32> to vector<16x1xf32>
    %cst_35 = arith.constant 3.200000e+01 : f32
    %80 = vector.broadcast %cst_35 : f32 to vector<16x1xf32>
    %81 = arith.divf %79, %80 : vector<16x1xf32>
    %82 = vector.broadcast %74 : vector<16x1xf32> to vector<16x32xf32>
    %83 = arith.subf %68, %82 : vector<16x32xf32>
    %cst_36 = arith.constant 9.99999996E-13 : f32
    %84 = vector.broadcast %cst_36 : f32 to vector<16x1xf32>
    %85 = arith.addf %81, %84 : vector<16x1xf32>
    %86 = math.rsqrt %85 : vector<16x1xf32>
    %87 = vector.broadcast %86 : vector<16x1xf32> to vector<16x32xf32>
    %88 = arith.mulf %83, %87 : vector<16x32xf32>
    %89 = vector.broadcast %69 : vector<1x32xf32> to vector<16x32xf32>
    %90 = arith.mulf %88, %89 : vector<16x32xf32>
    %91 = vector.broadcast %70 : vector<1x32xf32> to vector<16x32xf32>
    %92 = arith.addf %90, %91 : vector<16x32xf32>
    %c0_37 = arith.constant 0 : index
    %c0_38 = arith.constant 0 : index
    %c0_39 = arith.constant 0 : index
    %93 = vector.load %arg7[%c0_37, %c0_38, %c0_39] : memref<2x32x64xf32, #tpu.memory_space<vmem>>, vector<1x32x64xf32>
    %94 = vector.shape_cast %93 : vector<1x32x64xf32> to vector<32x64xf32>
    %cst_40 = arith.constant dense<0.000000e+00> : vector<16x64xf32>
    %95 = tpu.matmul %92, %94, %cst_40 {dimension_numbers = #tpu.dot_dimension_numbers<[1], [0], [0], [1], [0, 0, 1, 1], [], []>} : vector<16x32xf32>, vector<32x64xf32>, vector<16x64xf32> -> vector<16x64xf32>
    %c0_41 = arith.constant 0 : index
    %c0_42 = arith.constant 0 : index
    %c0_43 = arith.constant 0 : index
    %96 = vector.load %arg8[%c0_41, %c0_42, %c0_43] : memref<2x1x64xf32, #tpu.memory_space<vmem>>, vector<1x1x64xf32>
    %97 = vector.shape_cast %96 : vector<1x1x64xf32> to vector<1x64xf32>
    %98 = vector.broadcast %97 : vector<1x64xf32> to vector<16x64xf32>
    %99 = arith.addf %95, %98 : vector<16x64xf32>
    %100 = arith.mulf %99, %99 : vector<16x64xf32>
    %101 = arith.mulf %99, %100 : vector<16x64xf32>
    %cst_44 = arith.constant 4.471500e-02 : f32
    %102 = vector.broadcast %cst_44 : f32 to vector<16x64xf32>
    %103 = arith.mulf %102, %101 : vector<16x64xf32>
    %104 = arith.addf %99, %103 : vector<16x64xf32>
    %cst_45 = arith.constant 0.797884583 : f32
    %105 = vector.broadcast %cst_45 : f32 to vector<16x64xf32>
    %106 = arith.mulf %105, %104 : vector<16x64xf32>
    %107 = math.tanh %106 : vector<16x64xf32>
    %cst_46 = arith.constant 1.000000e+00 : f32
    %108 = vector.broadcast %cst_46 : f32 to vector<16x64xf32>
    %109 = arith.addf %108, %107 : vector<16x64xf32>
    %cst_47 = arith.constant 5.000000e-01 : f32
    %110 = vector.broadcast %cst_47 : f32 to vector<16x64xf32>
    %111 = arith.mulf %110, %109 : vector<16x64xf32>
    %112 = arith.mulf %99, %111 : vector<16x64xf32>
    %c0_48 = arith.constant 0 : index
    %c0_49 = arith.constant 0 : index
    %c0_50 = arith.constant 0 : index
    %113 = vector.load %arg9[%c0_48, %c0_49, %c0_50] : memref<2x64x32xf32, #tpu.memory_space<vmem>>, vector<1x64x32xf32>
    %114 = vector.shape_cast %113 : vector<1x64x32xf32> to vector<64x32xf32>
    %cst_51 = arith.constant dense<0.000000e+00> : vector<16x32xf32>
    %115 = tpu.matmul %112, %114, %cst_51 {dimension_numbers = #tpu.dot_dimension_numbers<[1], [0], [0], [1], [0, 0, 1, 1], [], []>} : vector<16x64xf32>, vector<64x32xf32>, vector<16x32xf32> -> vector<16x32xf32>
    %c0_52 = arith.constant 0 : index
    %c0_53 = arith.constant 0 : index
    %c0_54 = arith.constant 0 : index
    %116 = vector.load %arg10[%c0_52, %c0_53, %c0_54] : memref<2x1x32xf32, #tpu.memory_space<vmem>>, vector<1x1x32xf32>
    %117 = vector.shape_cast %116 : vector<1x1x32xf32> to vector<1x32xf32>
    %118 = vector.broadcast %117 : vector<1x32xf32> to vector<16x32xf32>
    %119 = arith.addf %115, %118 : vector<16x32xf32>
    %120 = arith.addf %92, %119 : vector<16x32xf32>
    %121 = vector.extract_strided_slice %67 {offsets = [2, 0], sizes = [1, 32], strides = [1, 1]} : vector<4x32xf32> to vector<1x32xf32>
    %122 = vector.extract_strided_slice %67 {offsets = [3, 0], sizes = [1, 32], strides = [1, 1]} : vector<4x32xf32> to vector<1x32xf32>
    %cst_55 = arith.constant dense<0.000000e+00> : vector<16xf32>
    %123 = vector.multi_reduction <add>, %120, %cst_55 [1] : vector<16x32xf32> to vector<16xf32>
    %124 = vector.shape_cast %123 : vector<16xf32> to vector<16x1xf32>
    %cst_56 = arith.constant 3.200000e+01 : f32
    %125 = vector.broadcast %cst_56 : f32 to vector<16x1xf32>
    %126 = arith.divf %124, %125 : vector<16x1xf32>
    %127 = vector.broadcast %126 : vector<16x1xf32> to vector<16x32xf32>
    %128 = arith.subf %120, %127 : vector<16x32xf32>
    %129 = arith.mulf %128, %128 : vector<16x32xf32>
    %cst_57 = arith.constant dense<0.000000e+00> : vector<16xf32>
    %130 = vector.multi_reduction <add>, %129, %cst_57 [1] : vector<16x32xf32> to vector<16xf32>
    %131 = vector.shape_cast %130 : vector<16xf32> to vector<16x1xf32>
    %cst_58 = arith.constant 3.200000e+01 : f32
    %132 = vector.broadcast %cst_58 : f32 to vector<16x1xf32>
    %133 = arith.divf %131, %132 : vector<16x1xf32>
    %134 = vector.broadcast %126 : vector<16x1xf32> to vector<16x32xf32>
    %135 = arith.subf %120, %134 : vector<16x32xf32>
    %cst_59 = arith.constant 9.99999996E-13 : f32
    %136 = vector.broadcast %cst_59 : f32 to vector<16x1xf32>
    %137 = arith.addf %133, %136 : vector<16x1xf32>
    %138 = math.rsqrt %137 : vector<16x1xf32>
    %139 = vector.broadcast %138 : vector<16x1xf32> to vector<16x32xf32>
    %140 = arith.mulf %135, %139 : vector<16x32xf32>
    %141 = vector.broadcast %121 : vector<1x32xf32> to vector<16x32xf32>
    %142 = arith.mulf %140, %141 : vector<16x32xf32>
    %143 = vector.broadcast %122 : vector<1x32xf32> to vector<16x32xf32>
    %144 = arith.addf %142, %143 : vector<16x32xf32>
    %c1 = arith.constant 1 : index
    %c0_60 = arith.constant 0 : index
    %c0_61 = arith.constant 0 : index
    %145 = vector.load %arg2[%c1, %c0_60, %c0_61] : memref<2x32x96xf32, #tpu.memory_space<vmem>>, vector<1x32x96xf32>
    %146 = vector.shape_cast %145 : vector<1x32x96xf32> to vector<32x96xf32>
    %cst_62 = arith.constant dense<0.000000e+00> : vector<16x96xf32>
    %147 = tpu.matmul %144, %146, %cst_62 {dimension_numbers = #tpu.dot_dimension_numbers<[1], [0], [0], [1], [0, 0, 1, 1], [], []>} : vector<16x32xf32>, vector<32x96xf32>, vector<16x96xf32> -> vector<16x96xf32>
    %c1_63 = arith.constant 1 : index
    %c0_64 = arith.constant 0 : index
    %c0_65 = arith.constant 0 : index
    %148 = vector.load %arg3[%c1_63, %c0_64, %c0_65] : memref<2x1x96xf32, #tpu.memory_space<vmem>>, vector<1x1x96xf32>
    %149 = vector.shape_cast %148 : vector<1x1x96xf32> to vector<1x96xf32>
    %150 = vector.broadcast %149 : vector<1x96xf32> to vector<16x96xf32>
    %151 = arith.addf %147, %150 : vector<16x96xf32>
    %152 = vector.extract_strided_slice %151 {offsets = [0, 0], sizes = [16, 32], strides = [1, 1]} : vector<16x96xf32> to vector<16x32xf32>
    %153 = vector.shape_cast %152 : vector<16x32xf32> to vector<2x8x32xf32>
    %154 = vector.extract_strided_slice %151 {offsets = [0, 32], sizes = [16, 32], strides = [1, 1]} : vector<16x96xf32> to vector<16x32xf32>
    %155 = vector.shape_cast %154 : vector<16x32xf32> to vector<2x8x32xf32>
    %156 = vector.extract_strided_slice %151 {offsets = [0, 64], sizes = [16, 32], strides = [1, 1]} : vector<16x96xf32> to vector<16x32xf32>
    %157 = vector.shape_cast %156 : vector<16x32xf32> to vector<2x8x32xf32>
    %c1_66 = arith.constant 1 : index
    %c0_67 = arith.constant 0 : index
    %c0_68 = arith.constant 0 : index
    %158 = vector.load %arg4[%c1_66, %c0_67, %c0_68] : memref<2x32x32xf32, #tpu.memory_space<vmem>>, vector<1x32x32xf32>
    %159 = vector.shape_cast %158 : vector<1x32x32xf32> to vector<32x32xf32>
    %cst_69 = arith.constant 0.000000e+00 : f32
    %160 = vector.broadcast %cst_69 : f32 to vector<16x32xf32>
    %161 = vector.extract_strided_slice %153 {offsets = [0, 0, 0], sizes = [2, 8, 16], strides = [1, 1, 1]} : vector<2x8x32xf32> to vector<2x8x16xf32>
    %162 = vector.extract_strided_slice %155 {offsets = [0, 0, 0], sizes = [2, 8, 16], strides = [1, 1, 1]} : vector<2x8x32xf32> to vector<2x8x16xf32>
    "tpu.trace_start"() <{level = 10 : i32, message = "bqd,bkd->bqk"}> : () -> ()
    %cst_70 = arith.constant dense<0.000000e+00> : vector<2x8x8xf32>
    %163 = tpu.matmul %161, %162, %cst_70 {dimension_numbers = #tpu.dot_dimension_numbers<[2], [2], [1], [1], [0, 0, 0, 1, 1, 1], [0], [0]>} : vector<2x8x16xf32>, vector<2x8x16xf32>, vector<2x8x8xf32> -> vector<2x8x8xf32>
    "tpu.trace_stop"() : () -> ()
    %cst_71 = arith.constant 2.500000e-01 : f32
    %164 = vector.broadcast %cst_71 : f32 to vector<2x8x8xf32>
    %165 = arith.mulf %163, %164 : vector<2x8x8xf32>
    %166 = arith.addf %165, %1 : vector<2x8x8xf32>
    %cst_72 = arith.constant dense<0xFF800000> : vector<2x8xf32>
    %167 = vector.multi_reduction <maximumf>, %166, %cst_72 [2] : vector<2x8x8xf32> to vector<2x8xf32>
    %168 = vector.shape_cast %167 : vector<2x8xf32> to vector<2x8x1xf32>
    %169 = vector.broadcast %168 : vector<2x8x1xf32> to vector<2x8x8xf32>
    %170 = arith.subf %166, %169 : vector<2x8x8xf32>
    %171 = math.exp %170 : vector<2x8x8xf32>
    %cst_73 = arith.constant dense<0.000000e+00> : vector<2x8xf32>
    %172 = vector.multi_reduction <add>, %171, %cst_73 [2] : vector<2x8x8xf32> to vector<2x8xf32>
    %173 = vector.shape_cast %172 : vector<2x8xf32> to vector<2x8x1xf32>
    %174 = tpu.reciprocal %173 {approx = true} : vector<2x8x1xf32> -> vector<2x8x1xf32>
    %175 = vector.broadcast %174 : vector<2x8x1xf32> to vector<2x8x8xf32>
    %176 = arith.mulf %171, %175 : vector<2x8x8xf32>
    %177 = vector.extract_strided_slice %157 {offsets = [0, 0, 0], sizes = [2, 8, 16], strides = [1, 1, 1]} : vector<2x8x32xf32> to vector<2x8x16xf32>
    "tpu.trace_start"() <{level = 10 : i32, message = "bqk,bkd->bqd"}> : () -> ()
    %cst_74 = arith.constant dense<0.000000e+00> : vector<2x8x16xf32>
    %178 = tpu.matmul %176, %177, %cst_74 {dimension_numbers = #tpu.dot_dimension_numbers<[2], [1], [1], [2], [0, 0, 0, 1, 1, 2], [0], [0]>} : vector<2x8x8xf32>, vector<2x8x16xf32>, vector<2x8x16xf32> -> vector<2x8x16xf32>
    "tpu.trace_stop"() : () -> ()
    %179 = vector.shape_cast %178 : vector<2x8x16xf32> to vector<16x16xf32>
    %180 = vector.extract_strided_slice %159 {offsets = [0, 0], sizes = [16, 32], strides = [1, 1]} : vector<32x32xf32> to vector<16x32xf32>
    %cst_75 = arith.constant dense<0.000000e+00> : vector<16x32xf32>
    %181 = tpu.matmul %179, %180, %cst_75 {dimension_numbers = #tpu.dot_dimension_numbers<[1], [0], [0], [1], [0, 0, 1, 1], [], []>} : vector<16x16xf32>, vector<16x32xf32>, vector<16x32xf32> -> vector<16x32xf32>
    %182 = arith.addf %160, %181 : vector<16x32xf32>
    %183 = vector.extract_strided_slice %153 {offsets = [0, 0, 16], sizes = [2, 8, 16], strides = [1, 1, 1]} : vector<2x8x32xf32> to vector<2x8x16xf32>
    %184 = vector.extract_strided_slice %155 {offsets = [0, 0, 16], sizes = [2, 8, 16], strides = [1, 1, 1]} : vector<2x8x32xf32> to vector<2x8x16xf32>
    "tpu.trace_start"() <{level = 10 : i32, message = "bqd,bkd->bqk"}> : () -> ()
    %cst_76 = arith.constant dense<0.000000e+00> : vector<2x8x8xf32>
    %185 = tpu.matmul %183, %184, %cst_76 {dimension_numbers = #tpu.dot_dimension_numbers<[2], [2], [1], [1], [0, 0, 0, 1, 1, 1], [0], [0]>} : vector<2x8x16xf32>, vector<2x8x16xf32>, vector<2x8x8xf32> -> vector<2x8x8xf32>
    "tpu.trace_stop"() : () -> ()
    %cst_77 = arith.constant 2.500000e-01 : f32
    %186 = vector.broadcast %cst_77 : f32 to vector<2x8x8xf32>
    %187 = arith.mulf %185, %186 : vector<2x8x8xf32>
    %188 = arith.addf %187, %1 : vector<2x8x8xf32>
    %cst_78 = arith.constant dense<0xFF800000> : vector<2x8xf32>
    %189 = vector.multi_reduction <maximumf>, %188, %cst_78 [2] : vector<2x8x8xf32> to vector<2x8xf32>
    %190 = vector.shape_cast %189 : vector<2x8xf32> to vector<2x8x1xf32>
    %191 = vector.broadcast %190 : vector<2x8x1xf32> to vector<2x8x8xf32>
    %192 = arith.subf %188, %191 : vector<2x8x8xf32>
    %193 = math.exp %192 : vector<2x8x8xf32>
    %cst_79 = arith.constant dense<0.000000e+00> : vector<2x8xf32>
    %194 = vector.multi_reduction <add>, %193, %cst_79 [2] : vector<2x8x8xf32> to vector<2x8xf32>
    %195 = vector.shape_cast %194 : vector<2x8xf32> to vector<2x8x1xf32>
    %196 = tpu.reciprocal %195 {approx = true} : vector<2x8x1xf32> -> vector<2x8x1xf32>
    %197 = vector.broadcast %196 : vector<2x8x1xf32> to vector<2x8x8xf32>
    %198 = arith.mulf %193, %197 : vector<2x8x8xf32>
    %199 = vector.extract_strided_slice %157 {offsets = [0, 0, 16], sizes = [2, 8, 16], strides = [1, 1, 1]} : vector<2x8x32xf32> to vector<2x8x16xf32>
    "tpu.trace_start"() <{level = 10 : i32, message = "bqk,bkd->bqd"}> : () -> ()
    %cst_80 = arith.constant dense<0.000000e+00> : vector<2x8x16xf32>
    %200 = tpu.matmul %198, %199, %cst_80 {dimension_numbers = #tpu.dot_dimension_numbers<[2], [1], [1], [2], [0, 0, 0, 1, 1, 2], [0], [0]>} : vector<2x8x8xf32>, vector<2x8x16xf32>, vector<2x8x16xf32> -> vector<2x8x16xf32>
    "tpu.trace_stop"() : () -> ()
    %201 = vector.shape_cast %200 : vector<2x8x16xf32> to vector<16x16xf32>
    %202 = vector.extract_strided_slice %159 {offsets = [16, 0], sizes = [16, 32], strides = [1, 1]} : vector<32x32xf32> to vector<16x32xf32>
    %cst_81 = arith.constant dense<0.000000e+00> : vector<16x32xf32>
    %203 = tpu.matmul %201, %202, %cst_81 {dimension_numbers = #tpu.dot_dimension_numbers<[1], [0], [0], [1], [0, 0, 1, 1], [], []>} : vector<16x16xf32>, vector<16x32xf32>, vector<16x32xf32> -> vector<16x32xf32>
    %204 = arith.addf %182, %203 : vector<16x32xf32>
    %c1_82 = arith.constant 1 : index
    %c0_83 = arith.constant 0 : index
    %c0_84 = arith.constant 0 : index
    %205 = vector.load %arg5[%c1_82, %c0_83, %c0_84] : memref<2x1x32xf32, #tpu.memory_space<vmem>>, vector<1x1x32xf32>
    %206 = vector.shape_cast %205 : vector<1x1x32xf32> to vector<1x32xf32>
    %207 = vector.broadcast %206 : vector<1x32xf32> to vector<16x32xf32>
    %208 = arith.addf %204, %207 : vector<16x32xf32>
    %c1_85 = arith.constant 1 : index
    %c0_86 = arith.constant 0 : index
    %c0_87 = arith.constant 0 : index
    %209 = vector.load %arg6[%c1_85, %c0_86, %c0_87] : memref<2x4x32xf32, #tpu.memory_space<vmem>>, vector<1x4x32xf32>
    %210 = vector.shape_cast %209 : vector<1x4x32xf32> to vector<4x32xf32>
    %211 = arith.addf %144, %208 : vector<16x32xf32>
    %212 = vector.extract_strided_slice %210 {offsets = [0, 0], sizes = [1, 32], strides = [1, 1]} : vector<4x32xf32> to vector<1x32xf32>
    %213 = vector.extract_strided_slice %210 {offsets = [1, 0], sizes = [1, 32], strides = [1, 1]} : vector<4x32xf32> to vector<1x32xf32>
    %cst_88 = arith.constant dense<0.000000e+00> : vector<16xf32>
    %214 = vector.multi_reduction <add>, %211, %cst_88 [1] : vector<16x32xf32> to vector<16xf32>
    %215 = vector.shape_cast %214 : vector<16xf32> to vector<16x1xf32>
    %cst_89 = arith.constant 3.200000e+01 : f32
    %216 = vector.broadcast %cst_89 : f32 to vector<16x1xf32>
    %217 = arith.divf %215, %216 : vector<16x1xf32>
    %218 = vector.broadcast %217 : vector<16x1xf32> to vector<16x32xf32>
    %219 = arith.subf %211, %218 : vector<16x32xf32>
    %220 = arith.mulf %219, %219 : vector<16x32xf32>
    %cst_90 = arith.constant dense<0.000000e+00> : vector<16xf32>
    %221 = vector.multi_reduction <add>, %220, %cst_90 [1] : vector<16x32xf32> to vector<16xf32>
    %222 = vector.shape_cast %221 : vector<16xf32> to vector<16x1xf32>
    %cst_91 = arith.constant 3.200000e+01 : f32
    %223 = vector.broadcast %cst_91 : f32 to vector<16x1xf32>
    %224 = arith.divf %222, %223 : vector<16x1xf32>
    %225 = vector.broadcast %217 : vector<16x1xf32> to vector<16x32xf32>
    %226 = arith.subf %211, %225 : vector<16x32xf32>
    %cst_92 = arith.constant 9.99999996E-13 : f32
    %227 = vector.broadcast %cst_92 : f32 to vector<16x1xf32>
    %228 = arith.addf %224, %227 : vector<16x1xf32>
    %229 = math.rsqrt %228 : vector<16x1xf32>
    %230 = vector.broadcast %229 : vector<16x1xf32> to vector<16x32xf32>
    %231 = arith.mulf %226, %230 : vector<16x32xf32>
    %232 = vector.broadcast %212 : vector<1x32xf32> to vector<16x32xf32>
    %233 = arith.mulf %231, %232 : vector<16x32xf32>
    %234 = vector.broadcast %213 : vector<1x32xf32> to vector<16x32xf32>
    %235 = arith.addf %233, %234 : vector<16x32xf32>
    %c1_93 = arith.constant 1 : index
    %c0_94 = arith.constant 0 : index
    %c0_95 = arith.constant 0 : index
    %236 = vector.load %arg7[%c1_93, %c0_94, %c0_95] : memref<2x32x64xf32, #tpu.memory_space<vmem>>, vector<1x32x64xf32>
    %237 = vector.shape_cast %236 : vector<1x32x64xf32> to vector<32x64xf32>
    %cst_96 = arith.constant dense<0.000000e+00> : vector<16x64xf32>
    %238 = tpu.matmul %235, %237, %cst_96 {dimension_numbers = #tpu.dot_dimension_numbers<[1], [0], [0], [1], [0, 0, 1, 1], [], []>} : vector<16x32xf32>, vector<32x64xf32>, vector<16x64xf32> -> vector<16x64xf32>
    %c1_97 = arith.constant 1 : index
    %c0_98 = arith.constant 0 : index
    %c0_99 = arith.constant 0 : index
    %239 = vector.load %arg8[%c1_97, %c0_98, %c0_99] : memref<2x1x64xf32, #tpu.memory_space<vmem>>, vector<1x1x64xf32>
    %240 = vector.shape_cast %239 : vector<1x1x64xf32> to vector<1x64xf32>
    %241 = vector.broadcast %240 : vector<1x64xf32> to vector<16x64xf32>
    %242 = arith.addf %238, %241 : vector<16x64xf32>
    %243 = arith.mulf %242, %242 : vector<16x64xf32>
    %244 = arith.mulf %242, %243 : vector<16x64xf32>
    %cst_100 = arith.constant 4.471500e-02 : f32
    %245 = vector.broadcast %cst_100 : f32 to vector<16x64xf32>
    %246 = arith.mulf %245, %244 : vector<16x64xf32>
    %247 = arith.addf %242, %246 : vector<16x64xf32>
    %cst_101 = arith.constant 0.797884583 : f32
    %248 = vector.broadcast %cst_101 : f32 to vector<16x64xf32>
    %249 = arith.mulf %248, %247 : vector<16x64xf32>
    %250 = math.tanh %249 : vector<16x64xf32>
    %cst_102 = arith.constant 1.000000e+00 : f32
    %251 = vector.broadcast %cst_102 : f32 to vector<16x64xf32>
    %252 = arith.addf %251, %250 : vector<16x64xf32>
    %cst_103 = arith.constant 5.000000e-01 : f32
    %253 = vector.broadcast %cst_103 : f32 to vector<16x64xf32>
    %254 = arith.mulf %253, %252 : vector<16x64xf32>
    %255 = arith.mulf %242, %254 : vector<16x64xf32>
    %c1_104 = arith.constant 1 : index
    %c0_105 = arith.constant 0 : index
    %c0_106 = arith.constant 0 : index
    %256 = vector.load %arg9[%c1_104, %c0_105, %c0_106] : memref<2x64x32xf32, #tpu.memory_space<vmem>>, vector<1x64x32xf32>
    %257 = vector.shape_cast %256 : vector<1x64x32xf32> to vector<64x32xf32>
    %cst_107 = arith.constant dense<0.000000e+00> : vector<16x32xf32>
    %258 = tpu.matmul %255, %257, %cst_107 {dimension_numbers = #tpu.dot_dimension_numbers<[1], [0], [0], [1], [0, 0, 1, 1], [], []>} : vector<16x64xf32>, vector<64x32xf32>, vector<16x32xf32> -> vector<16x32xf32>
    %c1_108 = arith.constant 1 : index
    %c0_109 = arith.constant 0 : index
    %c0_110 = arith.constant 0 : index
    %259 = vector.load %arg10[%c1_108, %c0_109, %c0_110] : memref<2x1x32xf32, #tpu.memory_space<vmem>>, vector<1x1x32xf32>
    %260 = vector.shape_cast %259 : vector<1x1x32xf32> to vector<1x32xf32>
    %261 = vector.broadcast %260 : vector<1x32xf32> to vector<16x32xf32>
    %262 = arith.addf %258, %261 : vector<16x32xf32>
    %263 = arith.addf %235, %262 : vector<16x32xf32>
    %264 = vector.extract_strided_slice %210 {offsets = [2, 0], sizes = [1, 32], strides = [1, 1]} : vector<4x32xf32> to vector<1x32xf32>
    %265 = vector.extract_strided_slice %210 {offsets = [3, 0], sizes = [1, 32], strides = [1, 1]} : vector<4x32xf32> to vector<1x32xf32>
    %cst_111 = arith.constant dense<0.000000e+00> : vector<16xf32>
    %266 = vector.multi_reduction <add>, %263, %cst_111 [1] : vector<16x32xf32> to vector<16xf32>
    %267 = vector.shape_cast %266 : vector<16xf32> to vector<16x1xf32>
    %cst_112 = arith.constant 3.200000e+01 : f32
    %268 = vector.broadcast %cst_112 : f32 to vector<16x1xf32>
    %269 = arith.divf %267, %268 : vector<16x1xf32>
    %270 = vector.broadcast %269 : vector<16x1xf32> to vector<16x32xf32>
    %271 = arith.subf %263, %270 : vector<16x32xf32>
    %272 = arith.mulf %271, %271 : vector<16x32xf32>
    %cst_113 = arith.constant dense<0.000000e+00> : vector<16xf32>
    %273 = vector.multi_reduction <add>, %272, %cst_113 [1] : vector<16x32xf32> to vector<16xf32>
    %274 = vector.shape_cast %273 : vector<16xf32> to vector<16x1xf32>
    %cst_114 = arith.constant 3.200000e+01 : f32
    %275 = vector.broadcast %cst_114 : f32 to vector<16x1xf32>
    %276 = arith.divf %274, %275 : vector<16x1xf32>
    %277 = vector.broadcast %269 : vector<16x1xf32> to vector<16x32xf32>
    %278 = arith.subf %263, %277 : vector<16x32xf32>
    %cst_115 = arith.constant 9.99999996E-13 : f32
    %279 = vector.broadcast %cst_115 : f32 to vector<16x1xf32>
    %280 = arith.addf %276, %279 : vector<16x1xf32>
    %281 = math.rsqrt %280 : vector<16x1xf32>
    %282 = vector.broadcast %281 : vector<16x1xf32> to vector<16x32xf32>
    %283 = arith.mulf %278, %282 : vector<16x32xf32>
    %284 = vector.broadcast %264 : vector<1x32xf32> to vector<16x32xf32>
    %285 = arith.mulf %283, %284 : vector<16x32xf32>
    %286 = vector.broadcast %265 : vector<1x32xf32> to vector<16x32xf32>
    %287 = arith.addf %285, %286 : vector<16x32xf32>
    %288 = vector.shape_cast %287 : vector<16x32xf32> to vector<2x8x32xf32>
    %289 = vector.extract_strided_slice %288 {offsets = [0, 7, 0], sizes = [2, 1, 32], strides = [1, 1, 1]} : vector<2x8x32xf32> to vector<2x1x32xf32>
    %290 = vector.shape_cast %289 : vector<2x1x32xf32> to vector<2x32xf32>
    %c0_116 = arith.constant 0 : index
    %c0_117 = arith.constant 0 : index
    %291 = vector.load %arg11[%c0_116, %c0_117] : memref<32x32xf32, #tpu.memory_space<vmem>>, vector<32x32xf32>
    %cst_118 = arith.constant dense<0.000000e+00> : vector<2x32xf32>
    %292 = tpu.matmul %290, %291, %cst_118 {dimension_numbers = #tpu.dot_dimension_numbers<[1], [0], [0], [1], [0, 0, 1, 1], [], []>} : vector<2x32xf32>, vector<32x32xf32>, vector<2x32xf32> -> vector<2x32xf32>
    %c0_119 = arith.constant 0 : index
    %c0_120 = arith.constant 0 : index
    %293 = vector.load %arg12[%c0_119, %c0_120] : memref<1x32xf32, #tpu.memory_space<vmem>>, vector<1x32xf32>
    %294 = vector.broadcast %293 : vector<1x32xf32> to vector<2x32xf32>
    %295 = arith.addf %292, %294 : vector<2x32xf32>
    %296 = math.tanh %295 : vector<2x32xf32>
    %c0_121 = arith.constant 0 : index
    %c0_122 = arith.constant 0 : index
    %297 = vector.load %arg13[%c0_121, %c0_122] : memref<32x128xf32, #tpu.memory_space<vmem>>, vector<32x128xf32>
    %cst_123 = arith.constant dense<0.000000e+00> : vector<2x128xf32>
    %298 = tpu.matmul %296, %297, %cst_123 {dimension_numbers = #tpu.dot_dimension_numbers<[1], [0], [0], [1], [0, 0, 1, 1], [], []>} : vector<2x32xf32>, vector<32x128xf32>, vector<2x128xf32> -> vector<2x128xf32>
    %c0_124 = arith.constant 0 : index
    %c0_125 = arith.constant 0 : index
    %299 = vector.load %arg14[%c0_124, %c0_125] : memref<1x128xf32, #tpu.memory_space<vmem>>, vector<1x128xf32>
    %300 = vector.broadcast %299 : vector<1x128xf32> to vector<2x128xf32>
    %301 = arith.addf %298, %300 : vector<2x128xf32>
    %c0_126 = arith.constant 0 : index
    %c0_127 = arith.constant 0 : index
    %302 = vector.load %arg15[%c0_126, %c0_127] : memref<2x128xf32, #tpu.memory_space<vmem>>, vector<2x128xf32>
    tpu.vector_store %arg15[%c0_126, %c0_127], %301 {strides = array<i32>} : memref<2x128xf32, #tpu.memory_space<vmem>>, vector<2x128xf32>,
    return
  }
}

</mosaic_0001>

<bundles_post_ra>
// kernel: text_splice_finetune_forward.1
= control target key start
LH: loop header
LB: loop body
LE: loop exit
PB: predicated region body
PF: predicated region fallthrough
CT: control target
= control target key end

     0   :  { %vm66_vm0 = vcmask 261120   ;;  %s3724_s0 = inlined_call_operand.vmem [shape: f32[16,32], index: 0, kind: input, shape index: {}]   ;;  %s3725_s1 = inlined_call_operand.vmem [shape: f32[2,8,8], index: 1, kind: input, shape index: {}]   ;;  %s3726_s2 = inlined_call_operand.vmem [shape: f32[2,32,96], index: 2, kind: input, shape index: {}]   ;;  %s3727_s3 = inlined_call_operand.vmem [shape: f32[2,1,96], index: 3, kind: input, shape index: {}]   ;;  %s3728_s4 = inlined_call_operand.vmem [shape: f32[2,32,32], index: 4, kind: input, shape index: {}]   ;;  %s3729_s5 = inlined_call_operand.vmem [shape: f32[2,1,32], index: 5, kind: input, shape index: {}]   ;;  %s3730_s6 = inlined_call_operand.vmem [shape: f32[2,4,32], index: 6, kind: input, shape index: {}]   ;;  %s3731_s7 = inlined_call_operand.vmem [shape: f32[2,32,64], index: 7, kind: input, shape index: {}]   ;;  %s3732_s8 = inlined_call_operand.vmem [shape: f32[2,1,64], index: 8, kind: input, shape index: {}]   ;;  %s3733_s9 = inlined_call_operand.vmem [shape: f32[2,64,32], index: 9, kind: input, shape index: {}]   ;;  %s3734_s10 = inlined_call_operand.vmem [shape: f32[2,1,32], index: 10, kind: input, shape index: {}]   ;;  %s3735_s11 = inlined_call_operand.vmem [shape: f32[32,32], index: 11, kind: input, shape index: {}]   ;;  %s3736_s12 = inlined_call_operand.vmem [shape: f32[1,32], index: 12, kind: input, shape index: {}]   ;;  %s3737_s13 = inlined_call_operand.vmem [shape: f32[32,128], index: 13, kind: input, shape index: {}]   ;;  %s3738_s14 = inlined_call_operand.vmem [shape: f32[1,128], index: 14, kind: input, shape index: {}]   ;;  %s3739_s15 = inlined_call_operand.hbm [shape: f32[2,128], index: 15, kind: output, shape index: {}]  }
   0x1   :  { %v58_v0 = vld [vmem:[%s3726_s2 + $0x18] sm:$0xff]  ;;  %v57_v1 = vld [vmem:[%s3726_s2 + $0x10] sm:$0xff]  ;;  %v3278_v2 = vld [vmem:[%s3724_s0] sm:$0xff] }
   0x2   :  { %2881 = vmatprep.subr.mxu0 %v58_v0  ;;  %v56_v3 = vld [vmem:[%s3726_s2 + $0x8] sm:$0xff]  ;;  %2889 = vmatprep.mubr.msk.f32.mxu0 %vm66_vm0, %v3278_v2 }
   0x3   :  { %2882 = vmatpush3.msra.mxu0 %v58_v0 }
   0x4   :  { %20 = vsyncpa [#allocation3], 0  ;;  %2883 = vmatprep.subr.mxu0 %v57_v1  ;;  %v55_v4 = vld [vmem:[%s3726_s2] sm:$0xff]  ;;  %v3291_v5 = vld [vmem:[%s3724_s0 + $0x8] sm:$0xff]  ;;  %v3181_v6 = vmov 0.0   ;;  %vm3182_vm1 = vmmov 0  }
   0x5   :  { %2884 = vmatpush3.msra.mxu0 %v57_v1  ;;  %2892 = vmatprep.subr.mxu1 %v3181_v6  ;;  %v2698_v8 = vld [vmem:[%s3727_s3] ss:$0 sm:$0xff]  ;;  %s3183_s16 = smov 96   ;;  %vm155_vm2 = vcmask 130048   ;;  %vm311_vm3 = vcmask 64512   ;;  %v3333_v20 = vld [vmem:[%s3725_s1 + $0x8] sm:$0xff] }
   0x6   :  { %2885 = vmatprep.subr.mxu0 %v56_v3  ;;  %2894 = vmatprep.mubr.msk.f32.mxu1 %vm3182_vm1, %v3181_v6  ;;  %v3327_v15 = vld [vmem:[%s3725_s1] sm:$0xff]  ;;  %s3184_s21 = smov 64   ;;  %s3185_s22 = smov 80   ;;  %vm1158_vm4 = vcmask 523264   ;;  %vm2524_vm5 = vcmask 1041409  }
   0x7   :  { %2886 = vmatpush3.msra.mxu0 %v56_v3  ;;  %s3186_s1 = smov 112   ;;  %s3187_s23 = smov 48  }
   0x8   :  { %2887 = vmatprep.subr.mxu0 %v55_v4 }
   0x9   :  { %2888 = vmatpush3.msra.mxu0 %v55_v4 }
   0xa   :  { %2890 = vmatmul.mubr.msk.f32.vlgmr.msra.gmra.mxu0 %vm66_vm0, %v3291_v5  ;;  %2912 = vmatprep.subr.mxu0 %v3181_v6 }
   0xb   :  { %2914 = vmatprep.mubr.msk.f32.mxu0 %vm3182_vm1, %v3181_v6 }
  0xca   :  { %v2891_v7 = vpop.f32.mrf.mxu0 }
  0xcb   :  { %v3308_v11 = vadd.f32 %v2891_v7, %v2698_v8 }
  0xcc   :  { %v139_v9 = vpop.f32.mrf.mxu0 }
  0xcd   :  { %v3304_v10 = vadd.f32 %v2698_v8, %v139_v9 }
  0xcf   :  { %153 = vrot.lane.b32.xlu0 %v3304_v10, %s3183_s16 }
  0xd3   :  { %231 = vrot.lane.b32.xlu0 %v3308_v11, %s3183_s16 }
 0x141   :  { %v154_v12 = vpop.permute.xlu0 %153 }
 0x142   :  { %2893 = vmatpush3.xpose.msk.msra.mxu1 %vm155_vm2, %v154_v12 }
 0x143   :  { %2897 = vmatprep.subr.mxu1 %v3181_v6 }
 0x145   :  { %2895 = vmatmul.mubr.msk.f32.vlgmr.msra.gmra.mxu1 %vm155_vm2, %v3304_v10  ;;  %v232_v13 = vpop.permute.xlu0 %231 }
 0x146   :  { %2898 = vmatpush3.xpose.msk.msra.mxu1 %vm155_vm2, %v232_v13  ;;  %2899 = vmatprep.mubr.msk.f32.mxu1 %vm3182_vm1, %v3181_v6 }
 0x147   :  { %2902 = vmatprep.subr.mxu1 %v3181_v6 }
 0x149   :  { %2900 = vmatmul.mubr.msk.f32.vlgmr.msra.gmra.mxu1 %vm155_vm2, %v3308_v11 }
 0x14a   :  { %2904 = vmatprep.mubr.msk.f32.mxu1 %vm3182_vm1, %v3181_v6 }
 0x205   :  { %v226_v14 = vpop.f32.mrf.mxu1 }
 0x206   :  { %v307_v16 = vmul.f32 0.25, %v226_v14 }
 0x207   :  { %v2896_v17 = vpop.f32.mrf.mxu1 }
 0x208   :  { %v309_v18 = vadd.f32 %v307_v16, %v3327_v15 }
 0x209   :  { %v303_v19 = vpop.f32.mrf.mxu1 }
 0x20a   :  { %v308_v21 = vmul.f32 0.25, %v303_v19  ;;  %v312_v22 = vsel %vm311_vm3, %v309_v18, -inf }
 0x20b   :  { %313 = vmax.xlane.f32.xlu1 %v312_v22  ;;  %v2901_v23 = vpop.f32.mrf.mxu1 }
 0x20c   :  { %v310_v24 = vadd.f32 %v308_v21, %v3333_v20  ;;  %v151_v23 = vld [vmem:[%s3728_s4 + $0x18] sm:$0xff] }
 0x20e   :  { %v315_v25 = vsel %vm311_vm3, %v310_v24, -inf }
 0x20f   :  { %316 = vmax.xlane.f32.xlu1 %v315_v25 }
 0x220   :  { %334 = vrot.lane.b32.xlu1 %v3304_v10, %s3184_s21 }
 0x224   :  { %410 = vrot.lane.b32.xlu1 %v3308_v11, %s3184_s21 }
 0x228   :  { %488 = vrot.lane.b32.xlu1 %v3304_v10, %s3185_s22 }
 0x22c   :  { %566 = vrot.lane.b32.xlu1 %v3308_v11, %s3185_s22 }
 0x294   :  { %v314_v26 = vpop.xlane.xlu1 %313 }
 0x295   :  { %v318_v27 = vsub.f32 %v309_v18, %v314_v26 }
 0x297   :  { %v320_v28 = vmul.f32 1.442695, %v318_v27 }
 0x298   :  { %v317_v29 = vpop.xlane.xlu1 %316 }
 0x299   :  { %3101 = vpow2.f32 %v320_v28  ;;  %v319_v30 = vsub.f32 %v310_v24, %v317_v29  ;;  %v150_v24 = vld [vmem:[%s3728_s4 + $0x10] sm:$0xff] }
 0x29b   :  { %v322_v31 = vmul.f32 1.442695, %v319_v30 }
 0x29c   :  { %v335_v32 = vpop.permute.xlu1 %334 }
 0x29d   :  { %3103 = vpow2.f32 %v322_v31  ;;  %2903 = vmatpush3.msra.mxu1 %v335_v32  ;;  %v2717_v31 = vld [vmem:[%s3729_s5] ss:$0 sm:$0xff] }
 0x29e   :  { %2907 = vmatprep.subr.mxu1 %v3181_v6 }
 0x2a0   :  { %v411_v33 = vpop.permute.xlu1 %410 }
 0x2a4   :  { %v489_v34 = vpop.permute.xlu1 %488 }
 0x2a5   :  { %2913 = vmatpush3.xpose.msk.msra.mxu0 %vm155_vm2, %v489_v34 }
 0x2a6   :  { %v3102_v35 = vpop.eup %3101  ;;  %2922 = vmatprep.subr.mxu0 %v3181_v6 }
 0x2a7   :  { %v324_v36 = vsel %vm311_vm3, %v3102_v35, 0.0 }
 0x2a8   :  { %325 = vadd.xlane.f32.xlu0 %v324_v36  ;;  %v567_v39 = vpop.permute.xlu1 %566 }
 0x2aa   :  { %v3104_v37 = vpop.eup %3103 }
 0x2ab   :  { %v327_v38 = vsel %vm311_vm3, %v3104_v37, 0.0 }
 0x2ac   :  { %328 = vadd.xlane.f32.xlu1 %v327_v38 }
 0x2bd   :  { %564 = vrot.lane.b32.xlu1 %v3308_v11, %s3186_s1 }
 0x2be   :  { %486 = vrot.lane.b32.xlu0 %v3304_v10, %s3186_s1 }
 0x331   :  { %v326_v40 = vpop.xlane.xlu0 %325 }
 0x332   :  { %3105 = vrcp.f32 %v326_v40 }
 0x335   :  { %v329_v41 = vpop.xlane.xlu1 %328  ;;  %v487_v42 = vpop.permute.xlu0 %486 }
 0x336   :  { %3107 = vrcp.f32 %v329_v41  ;;  %2915 = vmatmul.mubr.msk.f32.vlgmr.msra.gmra.mxu0 %vm155_vm2, %v487_v42 }
 0x337   :  { %2924 = vmatprep.mubr.msk.f32.mxu0 %vm3182_vm1, %v3181_v6 }
 0x339   :  { %v565_v47 = vpop.permute.xlu1 %564 }
 0x33f   :  { %v3106_v43 = vpop.eup %3105 }
 0x340   :  { %v332_v44 = vmul.f32 %v3106_v43, %v3102_v35 }
 0x342   :  { %2905 = vmatmul.mubr.msk.f32.vlgmr.msra.gmra.mxu1 %vm311_vm3, %v332_v44 }
 0x343   :  { %v3108_v45 = vpop.eup %3107  ;;  %2908 = vmatpush3.msra.mxu1 %v411_v33  ;;  %2909 = vmatprep.mubr.msk.f32.mxu1 %vm3182_vm1, %v3181_v6 }
 0x344   :  { %2917 = vmatprep.subr.mxu1 %v3181_v6  ;;  %v333_v46 = vmul.f32 %v3108_v45, %v3104_v37 }
 0x346   :  { %2910 = vmatmul.mubr.msk.f32.vlgmr.msra.gmra.mxu1 %vm311_vm3, %v333_v46 }
 0x347   :  { %2918 = vmatpush3.xpose.msk.msra.mxu1 %vm155_vm2, %v567_v39  ;;  %2919 = vmatprep.mubr.msk.f32.mxu1 %vm3182_vm1, %v3181_v6 }
 0x348   :  { %2927 = vmatprep.subr.mxu1 %v3181_v6 }
 0x34a   :  { %2920 = vmatmul.mubr.msk.f32.vlgmr.msra.gmra.mxu1 %vm155_vm2, %v565_v47 }
 0x34b   :  { %2929 = vmatprep.mubr.msk.f32.mxu1 %vm3182_vm1, %v3181_v6 }
 0x3f6   :  { %v560_v48 = vpop.f32.mrf.mxu0 }
 0x3f7   :  { %v642_v49 = vmul.f32 0.25, %v560_v48 }
 0x3f8   :  { %v2916_v50 = vpop.f32.mrf.mxu0 }
 0x3f9   :  { %v644_v51 = vadd.f32 %v642_v49, %v3327_v15 }
 0x3fb   :  { %v646_v52 = vsel %vm311_vm3, %v644_v51, -inf }
 0x3fc   :  { %647 = vmax.xlane.f32.xlu1 %v646_v52  ;;  %v1034_v52 = vld [vmem:[%s3731_s7 + $0x8] sm:$0xff] }
 0x402   :  { %v406_v53 = vpop.f32.mrf.mxu1 }
 0x404   :  { %v2906_v54 = vpop.f32.mrf.mxu1 }
 0x406   :  { %v482_v55 = vpop.f32.mrf.mxu1 }
 0x408   :  { %v2911_v56 = vpop.f32.mrf.mxu1 }
 0x40a   :  { %v638_v57 = vpop.f32.mrf.mxu1 }
 0x40b   :  { %v643_v58 = vmul.f32 0.25, %v638_v57 }
 0x40c   :  { %v2921_v59 = vpop.f32.mrf.mxu1 }
 0x40d   :  { %v645_v60 = vadd.f32 %v643_v58, %v3333_v20 }
 0x40f   :  { %v649_v61 = vsel %vm311_vm3, %v645_v60, -inf }
 0x410   :  { %650 = vmax.xlane.f32.xlu0 %v649_v61 }
 0x426   :  { %744 = vrot.lane.b32.xlu0 %v3308_v11, %s3187_s23  ;;  %v149_v11 = vld [vmem:[%s3728_s4 + $0x8] sm:$0xff] }
 0x485   :  { %v648_v62 = vpop.xlane.xlu1 %647 }
 0x486   :  { %v652_v63 = vsub.f32 %v644_v51, %v648_v62  ;;  %v1035_v51 = vld [vmem:[%s3731_s7 + $0x10] sm:$0xff] }
 0x488   :  { %v654_v0 = vmul.f32 1.442695, %v652_v63  ;;  %v3425_v63 = vld [vmem:[%s3730_s6] sm:$0xf] }
 0x48a   :  { %3109 = vpow2.f32 %v654_v0 }
 0x497   :  { %v3110_v1 = vpop.eup %3109 }
 0x498   :  { %v658_v3 = vsel %vm311_vm3, %v3110_v1, 0.0 }
 0x499   :  { %659 = vadd.xlane.f32.xlu1 %v658_v3  ;;  %v651_v4 = vpop.xlane.xlu0 %650 }
 0x49a   :  { %v653_v7 = vsub.f32 %v645_v60, %v651_v4  ;;  %v1021_v60 = vlaneseq }
 0x49c   :  { %v656_v8 = vmul.f32 1.442695, %v653_v7  ;;  %v3419_v61 = vshrl.u32 %v1021_v60, 7 }
 0x49d   :  { %v745_v9 = vpop.permute.xlu0 %744 }
 0x49e   :  { %3111 = vpow2.f32 %v656_v8  ;;  %2928 = vmatpush3.msra.mxu1 %v745_v9  ;;  %v1023_v62 = vsub.s32 0, %v3419_v61  ;;  %v1029_v3 = vsub.s32 1, %v3419_v61 }
 0x49f   :  { %2939 = vmatprep.subr.mxu1 %v149_v11 }
 0x4ab   :  { %v3112_v12 = vpop.eup %3111 }
 0x4ac   :  { %v661_v13 = vsel %vm311_vm3, %v3112_v12, 0.0 }
 0x4ad   :  { %662 = vadd.xlane.f32.xlu1 %v661_v13 }
 0x4be   :  { %668 = vrot.lane.b32.xlu1 %v3304_v10, %s3187_s23  ;;  %v148_v10 = vld [vmem:[%s3728_s4] sm:$0xff] }
 0x522   :  { %v660_v14 = vpop.xlane.xlu1 %659 }
 0x523   :  { %3113 = vrcp.f32 %v660_v14 }
 0x530   :  { %v3114_v17 = vpop.eup %3113 }
 0x531   :  { %v666_v19 = vmul.f32 %v3114_v17, %v3110_v1  ;;  %v1024_v1 = vrot.slane %v3425_v63, %v1023_v62  ;;  %v1149_v17 = vld [vmem:[%s3733_s9 + $0x30] sm:$0xff] }
 0x536   :  { %v663_v16 = vpop.xlane.xlu1 %662 }
 0x537   :  { %3115 = vrcp.f32 %v663_v16  ;;  %v1150_v16 = vld [vmem:[%s3733_s9 + $0x38] sm:$0xff] }
 0x53a   :  { %v669_v18 = vpop.permute.xlu1 %668 }
 0x53b   :  { %2923 = vmatpush3.msra.mxu0 %v669_v18  ;;  %v1148_v18 = vld [vmem:[%s3733_s9 + $0x28] sm:$0xff] }
 0x53c   :  { %2925 = vmatmul.mubr.msk.f32.vlgmr.msra.gmra.mxu0 %vm311_vm3, %v666_v19  ;;  %2932 = vmatprep.subr.mxu0 %v151_v23  ;;  %v1147_v19 = vld [vmem:[%s3733_s9 + $0x20] sm:$0xff] }
 0x53d   :  { %2933 = vmatpush3.msra.mxu0 %v151_v23  ;;  %v1143_v23 = vld [vmem:[%s3733_s9] sm:$0xff] }
 0x53e   :  { %2934 = vmatprep.subr.mxu0 %v150_v24 }
 0x53f   :  { %2935 = vmatpush3.msra.mxu0 %v150_v24  ;;  %v2718_v24 = vld [vmem:[%s3732_s8] ss:$0 sm:$0xff] }
 0x544   :  { %v3116_v21 = vpop.eup %3115 }
 0x545   :  { %v667_v22 = vmul.f32 %v3116_v21, %v3112_v12  ;;  %v1030_v12 = vrot.slane %v3425_v63, %v1029_v3  ;;  %v1146_v21 = vld [vmem:[%s3733_s9 + $0x18] sm:$0xff] }
 0x547   :  { %2930 = vmatmul.mubr.msk.f32.vlgmr.msra.gmra.mxu1 %vm311_vm3, %v667_v22  ;;  %v1145_v22 = vld [vmem:[%s3733_s9 + $0x10] sm:$0xff] }
 0x548   :  { %2940 = vmatpush3.msra.mxu1 %v149_v11  ;;  %2943 = vmatprep.mubr.msk.f32.mxu1 %vm155_vm2, %v406_v53  ;;  %v1033_v53 = vld [vmem:[%s3731_s7] sm:$0xff] }
 0x549   :  { %2941 = vmatprep.subr.mxu1 %v148_v10 }
 0x54a   :  { %2942 = vmatpush3.msra.mxu1 %v148_v10  ;;  %v1144_v10 = vld [vmem:[%s3733_s9 + $0x8] sm:$0xff] }
 0x54b   :  { %2944 = vmatmul.mubr.msk.f32.vlgmr.msra.gmra.mxu1 %vm155_vm2, %v482_v55  ;;  %2957 = vmatprep.subr.mxu1 %v1150_v16 }
 0x54c   :  { %2958 = vmatpush3.msra.mxu1 %v1150_v16 }
 0x54d   :  { %2959 = vmatprep.subr.mxu1 %v1149_v17 }
 0x54e   :  { %2960 = vmatpush3.msra.mxu1 %v1149_v17 }
 0x54f   :  { %2961 = vmatprep.subr.mxu1 %v1148_v18 }
 0x550   :  { %2962 = vmatpush3.msra.mxu1 %v1148_v18 }
 0x551   :  { %2963 = vmatprep.subr.mxu1 %v1147_v19 }
 0x552   :  { %2964 = vmatpush3.msra.mxu1 %v1147_v19  ;;  %v1270_v19 = vsub.s32 2, %v3419_v61 }
 0x553   :  { %2965 = vmatprep.subr.mxu1 %v1146_v21 }
 0x554   :  { %2966 = vmatpush3.msra.mxu1 %v1146_v21 }
 0x555   :  { %2967 = vmatprep.subr.mxu1 %v1145_v22 }
 0x556   :  { %2968 = vmatpush3.msra.mxu1 %v1145_v22  ;;  %v1271_v22 = vrot.slane %v3425_v63, %v1270_v19 }
 0x557   :  { %2969 = vmatprep.subr.mxu1 %v1144_v10 }
 0x558   :  { %2970 = vmatpush3.msra.mxu1 %v1144_v10  ;;  %v1276_v10 = vsub.s32 3, %v3419_v61  ;;  %v2602_v61 = vld [vmem:[%s3737_s13 + $0x18] sm:$0xff] }
 0x559   :  { %2971 = vmatprep.subr.mxu1 %v1143_v23 }
 0x55a   :  { %2972 = vmatpush3.msra.mxu1 %v1143_v23 }
 0x55b   :  { %2992 = vmatprep.subr.mxu1 %v3181_v6 }
 0x5fc   :  { %v740_v25 = vpop.f32.mrf.mxu0 }
 0x5fd   :  { %2936 = vmatprep.mubr.msk.f32.mxu0 %vm155_vm2, %v740_v25 }
 0x5fe   :  { %v2926_v26 = vpop.f32.mrf.mxu0 }
 0x607   :  { %v816_v27 = vpop.f32.mrf.mxu1 }
 0x608   :  { %2937 = vmatmul.mubr.msk.f32.vlgmr.msra.gmra.mxu0 %vm155_vm2, %v816_v27 }
 0x609   :  { %v2931_v28 = vpop.f32.mrf.mxu1 }
 0x60b   :  { %v2945_v29 = vpop.f32.mrf.mxu1 }
 0x60d   :  { %v973_v33 = vpop.f32.mrf.mxu1 }
 0x6c8   :  { %v2938_v30 = vpop.f32.mrf.mxu0 }
 0x6c9   :  { %v979_v32 = vadd.f32 %v2945_v29, %v2938_v30 }
 0x6ca   :  { %v892_v34 = vpop.f32.mrf.mxu0 }
 0x6cb   :  { %v990_v35 = vadd.f32 %v2717_v31, %v979_v32  ;;  %v974_v36 = vadd.f32 %v973_v33, %v892_v34 }
 0x6cd   :  { %v989_v37 = vadd.f32 %v2717_v31, %v974_v36  ;;  %v993_v38 = vadd.f32 %v990_v35, %v3291_v5 }
 0x6cf   :  { %v997_v39 = vsel %vm66_vm0, %v993_v38, 0.0  ;;  %v992_v40 = vadd.f32 %v989_v37, %v3278_v2  ;;  %v1036_v2 = vld [vmem:[%s3731_s7 + $0x18] sm:$0xff] }
 0x6d0   :  { %998 = vadd.xlane.f32.xlu0 %v997_v39  ;;  %2946 = vmatprep.subr.mxu0 %v1036_v2 }
 0x6d1   :  { %v994_v41 = vsel %vm66_vm0, %v992_v40, 0.0  ;;  %2947 = vmatpush3.msra.mxu0 %v1036_v2 }
 0x6d2   :  { %995 = vadd.xlane.f32.xlu1 %v994_v41  ;;  %2948 = vmatprep.subr.mxu0 %v1035_v51 }
 0x6d3   :  { %2949 = vmatpush3.msra.mxu0 %v1035_v51 }
 0x6d4   :  { %2950 = vmatprep.subr.mxu0 %v1034_v52 }
 0x6d5   :  { %2951 = vmatpush3.msra.mxu0 %v1034_v52 }
 0x6d6   :  { %2952 = vmatprep.subr.mxu0 %v1033_v53 }
 0x6d7   :  { %2953 = vmatpush3.msra.mxu0 %v1033_v53 }
 0x759   :  { %v999_v42 = vpop.xlane.xlu0 %998 }
 0x75a   :  { %v1002_v43 = vmul.f32 0.03125, %v999_v42 }
 0x75b   :  { %v996_v44 = vpop.xlane.xlu1 %995 }
 0x75c   :  { %v1004_v45 = vsub.f32 %v993_v38, %v1002_v43  ;;  %v1001_v46 = vmul.f32 0.03125, %v996_v44 }
 0x75e   :  { %v1003_v47 = vsub.f32 %v992_v40, %v1001_v46  ;;  %v1006_v48 = vmul.f32 %v1004_v45, %v1004_v45 }
 0x760   :  { %v1010_v49 = vsel %vm66_vm0, %v1006_v48, 0.0  ;;  %v1005_v50 = vmul.f32 %v1003_v47, %v1003_v47 }
 0x761   :  { %1011 = vadd.xlane.f32.xlu0 %v1010_v49 }
 0x762   :  { %v1007_v5 = vsel %vm66_vm0, %v1005_v50, 0.0 }
 0x763   :  { %1008 = vadd.xlane.f32.xlu1 %v1007_v5 }
 0x7ea   :  { %v1012_v54 = vpop.xlane.xlu0 %1011 }
 0x7eb   :  { %v1014_v55 = vmul.f32 0.03125, %v1012_v54 }
 0x7ec   :  { %v1009_v56 = vpop.xlane.xlu1 %1008 }
 0x7ed   :  { %v1016_v57 = vadd.f32 1e-12, %v1014_v55  ;;  %v1013_v58 = vmul.f32 0.03125, %v1009_v56 }
 0x7ef   :  { %3117 = vrsqrt.f32 %v1016_v57  ;;  %v1015_v59 = vadd.f32 1e-12, %v1013_v58 }
 0x7f1   :  { %3119 = vrsqrt.f32 %v1015_v59 }
 0x7fc   :  { %v3118_v0 = vpop.eup %3117 }
 0x7fd   :  { %v1020_v4 = vmul.f32 %v3118_v0, %v1004_v45 }
 0x7fe   :  { %v3120_v7 = vpop.eup %3119 }
 0x7ff   :  { %v1019_v8 = vmul.f32 %v3120_v7, %v1003_v47  ;;  %v1026_v9 = vmul.f32 %v1024_v1, %v1020_v4  ;;  %v2721_v47 = vld [vmem:[%s3734_s10] ss:$0 sm:$0xff]  ;;  %v2727_v7 = vld [vmem:[%s3726_s2 + $0x38] sm:$0xff] }
 0x800   :  { %2976 = vmatprep.subr.mxu0 %v2727_v7 }
 0x801   :  { %v1025_v13 = vmul.f32 %v1024_v1, %v1019_v8  ;;  %v1032_v14 = vadd.f32 %v1030_v12, %v1026_v9  ;;  %v2726_v8 = vld [vmem:[%s3726_s2 + $0x30] sm:$0xff]  ;;  %v2725_v9 = vld [vmem:[%s3726_s2 + $0x28] sm:$0xff] }
 0x803   :  { %v3434_v11 = vadd.f32 %v1030_v12, %v1025_v13  ;;  %v2724_v12 = vld [vmem:[%s3726_s2 + $0x20] sm:$0xff] }
 0x805   :  { %2954 = vmatprep.mubr.msk.f32.mxu0 %vm66_vm0, %v3434_v11 }
 0x806   :  { %2955 = vmatmul.mubr.msk.f32.vlgmr.msra.gmra.mxu0 %vm66_vm0, %v1032_v14 }
 0x807   :  { %2977 = vmatpush3.msra.mxu0 %v2727_v7 }
 0x808   :  { %2978 = vmatprep.subr.mxu0 %v2726_v8 }
 0x809   :  { %2979 = vmatpush3.msra.mxu0 %v2726_v8 }
 0x80a   :  { %2980 = vmatprep.subr.mxu0 %v2725_v9 }
 0x80b   :  { %2981 = vmatpush3.msra.mxu0 %v2725_v9 }
 0x80c   :  { %2982 = vmatprep.subr.mxu0 %v2724_v12 }
 0x80d   :  { %2983 = vmatpush3.msra.mxu0 %v2724_v12 }
 0x80e   :  { %2987 = vmatprep.subr.mxu0 %v3181_v6 }
 0x8c6   :  { %v2956_v25 = vpop.f32.mrf.mxu0 }
 0x8c7   :  { %v1122_v26 = vadd.f32 %v2956_v25, %v2718_v24 }
 0x8c8   :  { %v1116_v27 = vpop.f32.mrf.mxu0 }
 0x8c9   :  { %v1126_v28 = vmul.f32 %v1122_v26, %v1122_v26  ;;  %v1117_v29 = vadd.f32 %v2718_v24, %v1116_v27  ;;  %v1277_v27 = vrot.slane %v3425_v63, %v1276_v10 }
 0x8cb   :  { %v1128_v30 = vmul.f32 %v1126_v28, %v1122_v26  ;;  %v1125_v31 = vmul.f32 %v1117_v29, %v1117_v29 }
 0x8cd   :  { %v1130_v32 = vmul.f32 0.044715, %v1128_v30  ;;  %v1127_v33 = vmul.f32 %v1125_v31, %v1117_v29  ;;  %v2729_v31 = vld [vmem:[%s3727_s3 + $0x1] ss:$0 sm:$0xff] }
 0x8cf   :  { %v1132_v34 = vadd.f32 %v1130_v32, %v1122_v26  ;;  %v1129_v35 = vmul.f32 0.044715, %v1127_v33 }
 0x8d1   :  { %v1134_v36 = vmul.f32 0.7978846, %v1132_v34  ;;  %v1131_v37 = vadd.f32 %v1129_v35, %v1117_v29 }
 0x8d3   :  { %3121 = vtanh.f32 %v1134_v36  ;;  %v1133_v38 = vmul.f32 0.7978846, %v1131_v37 }
 0x8d5   :  { %3123 = vtanh.f32 %v1133_v38 }
 0x8e0   :  { %v3122_v39 = vpop.eup %3121 }
 0x8e1   :  { %v1138_v40 = vadd.f32 1.0, %v3122_v39 }
 0x8e2   :  { %v3124_v41 = vpop.eup %3123 }
 0x8e3   :  { %v1137_v42 = vadd.f32 1.0, %v3124_v41  ;;  %v1140_v43 = vmul.f32 0.5, %v1138_v40 }
 0x8e5   :  { %v1139_v44 = vmul.f32 0.5, %v1137_v42  ;;  %v1142_v46 = vmul.f32 %v1140_v43, %v1122_v26 }
 0x8e7   :  { %v1141_v45 = vmul.f32 %v1139_v44, %v1117_v29 }
 0x8e9   :  { %2973 = vmatprep.mubr.msk.f32.mxu1 %vm1158_vm4, %v1141_v45 }
 0x8ea   :  { %2974 = vmatmul.mubr.msk.f32.vlgmr.msra.gmra.mxu1 %vm1158_vm4, %v1142_v46 }
 0x8eb   :  { %2994 = vmatprep.mubr.msk.f32.mxu1 %vm3182_vm1, %v3181_v6 }
 0x9aa   :  { %v2975_v48 = vpop.f32.mrf.mxu1 }
 0x9ab   :  { %v1237_v49 = vadd.f32 %v2975_v48, %v2721_v47 }
 0x9ac   :  { %v1231_v50 = vpop.f32.mrf.mxu1 }
 0x9ad   :  { %v1232_v5 = vadd.f32 %v2721_v47, %v1231_v50  ;;  %v1241_v2 = vadd.f32 %v1237_v49, %v1032_v14 }
 0x9af   :  { %v1245_v51 = vsel %vm66_vm0, %v1241_v2, 0.0  ;;  %v1240_v52 = vadd.f32 %v1232_v5, %v3434_v11 }
 0x9b0   :  { %1246 = vadd.xlane.f32.xlu0 %v1245_v51 }
 0x9b1   :  { %v1242_v53 = vsel %vm66_vm0, %v1240_v52, 0.0 }
 0x9b2   :  { %1243 = vadd.xlane.f32.xlu1 %v1242_v53 }
 0xa39   :  { %v1247_v54 = vpop.xlane.xlu0 %1246 }
 0xa3a   :  { %v1249_v55 = vmul.f32 0.03125, %v1247_v54 }
 0xa3b   :  { %v1244_v56 = vpop.xlane.xlu1 %1243 }
 0xa3c   :  { %v1251_v57 = vsub.f32 %v1241_v2, %v1249_v55  ;;  %v1248_v58 = vmul.f32 0.03125, %v1244_v56 }
 0xa3e   :  { %v1250_v59 = vsub.f32 %v1240_v52, %v1248_v58  ;;  %v1253_v60 = vmul.f32 %v1251_v57, %v1251_v57 }
 0xa40   :  { %v1257_v0 = vsel %vm66_vm0, %v1253_v60, 0.0  ;;  %v1252_v1 = vmul.f32 %v1250_v59, %v1250_v59 }
 0xa41   :  { %1258 = vadd.xlane.f32.xlu0 %v1257_v0 }
 0xa42   :  { %v1254_v4 = vsel %vm66_vm0, %v1252_v1, 0.0 }
 0xa43   :  { %1255 = vadd.xlane.f32.xlu1 %v1254_v4 }
 0xaca   :  { %v1259_v13 = vpop.xlane.xlu0 %1258 }
 0xacb   :  { %v1261_v11 = vmul.f32 0.03125, %v1259_v13 }
 0xacc   :  { %v1256_v14 = vpop.xlane.xlu1 %1255 }
 0xacd   :  { %v1263_v16 = vadd.f32 1e-12, %v1261_v11  ;;  %v1260_v17 = vmul.f32 0.03125, %v1256_v14 }
 0xacf   :  { %3125 = vrsqrt.f32 %v1263_v16  ;;  %v1262_v18 = vadd.f32 1e-12, %v1260_v17 }
 0xad1   :  { %3127 = vrsqrt.f32 %v1262_v18 }
 0xadc   :  { %v3126_v21 = vpop.eup %3125 }
 0xadd   :  { %v1267_v23 = vmul.f32 %v3126_v21, %v1251_v57 }
 0xade   :  { %v3128_v24 = vpop.eup %3127 }
 0xadf   :  { %v1266_v25 = vmul.f32 %v3128_v24, %v1250_v59  ;;  %v1273_v26 = vmul.f32 %v1271_v22, %v1267_v23 }
 0xae1   :  { %v1272_v28 = vmul.f32 %v1271_v22, %v1266_v25  ;;  %v3502_v30 = vadd.f32 %v1277_v27, %v1273_v26 }
 0xae3   :  { %v3500_v29 = vadd.f32 %v1277_v27, %v1272_v28 }
 0xae5   :  { %2984 = vmatprep.mubr.msk.f32.mxu0 %vm66_vm0, %v3500_v29 }
 0xae6   :  { %2985 = vmatmul.mubr.msk.f32.vlgmr.msra.gmra.mxu0 %vm66_vm0, %v3502_v30 }
 0xae7   :  { %2989 = vmatprep.mubr.msk.f32.mxu0 %vm3182_vm1, %v3181_v6 }
 0xba6   :  { %v2986_v32 = vpop.f32.mrf.mxu0 }
 0xba7   :  { %v3513_v63 = vadd.f32 %v2986_v32, %v2729_v31 }
 0xba8   :  { %v1365_v33 = vpop.f32.mrf.mxu0 }
 0xba9   :  { %v3515_v34 = vadd.f32 %v2729_v31, %v1365_v33  ;;  %1457 = vrot.lane.b32.xlu0 %v3513_v63, %s3183_s16 }
 0xbab   :  { %1380 = vrot.lane.b32.xlu1 %v3515_v34, %s3183_s16 }
 0xc1b   :  { %v1458_v35 = vpop.permute.xlu0 %1457 }
 0xc1c   :  { %2993 = vmatpush3.xpose.msk.msra.mxu1 %vm155_vm2, %v1458_v35 }
 0xc1d   :  { %v1381_v36 = vpop.permute.xlu1 %1380  ;;  %3002 = vmatprep.subr.mxu1 %v3181_v6 }
 0xc1e   :  { %2988 = vmatpush3.xpose.msk.msra.mxu0 %vm155_vm2, %v1381_v36 }
 0xc1f   :  { %2995 = vmatmul.mubr.msk.f32.vlgmr.msra.gmra.mxu1 %vm155_vm2, %v3513_v63  ;;  %2997 = vmatprep.subr.mxu0 %v3181_v6 }
 0xc20   :  { %3004 = vmatprep.mubr.msk.f32.mxu1 %vm3182_vm1, %v3181_v6 }
 0xc21   :  { %2990 = vmatmul.mubr.msk.f32.vlgmr.msra.gmra.mxu0 %vm155_vm2, %v3515_v34 }
 0xc22   :  { %2999 = vmatprep.mubr.msk.f32.mxu0 %vm3182_vm1, %v3181_v6 }
 0xcdf   :  { %v1529_v37 = vpop.f32.mrf.mxu1 }
 0xce0   :  { %v1534_v38 = vmul.f32 0.25, %v1529_v37 }
 0xce1   :  { %v1452_v39 = vpop.f32.mrf.mxu0  ;;  %v2996_v40 = vpop.f32.mrf.mxu1 }
 0xce2   :  { %v1533_v41 = vmul.f32 0.25, %v1452_v39  ;;  %v1536_v42 = vadd.f32 %v1534_v38, %v3333_v20 }
 0xce3   :  { %v2991_v43 = vpop.f32.mrf.mxu0 }
 0xce4   :  { %v1540_v44 = vsel %vm311_vm3, %v1536_v42, -inf  ;;  %v1535_v45 = vadd.f32 %v1533_v41, %v3327_v15  ;;  %v2733_v41 = vld [vmem:[%s3728_s4 + $0x28] sm:$0xff] }
 0xce5   :  { %1541 = vmax.xlane.f32.xlu0 %v1540_v44 }
 0xce6   :  { %v1537_v46 = vsel %vm311_vm3, %v1535_v45, -inf }
 0xce7   :  { %1538 = vmax.xlane.f32.xlu1 %v1537_v46 }
 0xcf8   :  { %1559 = vrot.lane.b32.xlu1 %v3515_v34, %s3184_s21 }
 0xcfb   :  { %1635 = vrot.lane.b32.xlu0 %v3513_v63, %s3184_s21 }
 0xcfc   :  { %1713 = vrot.lane.b32.xlu1 %v3515_v34, %s3185_s22 }
 0xd00   :  { %1791 = vrot.lane.b32.xlu1 %v3513_v63, %s3185_s22 }
 0xd6e   :  { %v1542_v47 = vpop.xlane.xlu0 %1541 }
 0xd6f   :  { %v1544_v48 = vsub.f32 %v1536_v42, %v1542_v47  ;;  %v2735_v47 = vld [vmem:[%s3728_s4 + $0x38] sm:$0xff] }
 0xd70   :  { %v1539_v49 = vpop.xlane.xlu1 %1538 }
 0xd71   :  { %v1547_v50 = vmul.f32 1.442695, %v1544_v48  ;;  %v1543_v5 = vsub.f32 %v1535_v45, %v1539_v49  ;;  %v2732_v45 = vld [vmem:[%s3728_s4 + $0x20] sm:$0xff]  ;;  %v2734_v48 = vld [vmem:[%s3728_s4 + $0x30] sm:$0xff] }
 0xd72   :  { %v1636_v2 = vpop.permute.xlu0 %1635 }
 0xd73   :  { %3129 = vpow2.f32 %v1547_v50  ;;  %v1545_v51 = vmul.f32 1.442695, %v1543_v5  ;;  %3003 = vmatpush3.msra.mxu1 %v1636_v2 }
 0xd74   :  { %v1560_v52 = vpop.permute.xlu1 %1559  ;;  %3012 = vmatprep.subr.mxu1 %v3181_v6 }
 0xd75   :  { %3131 = vpow2.f32 %v1545_v51  ;;  %2998 = vmatpush3.msra.mxu0 %v1560_v52 }
 0xd76   :  { %3007 = vmatprep.subr.mxu0 %v3181_v6 }
 0xd78   :  { %v1714_v57 = vpop.permute.xlu1 %1713 }
 0xd7c   :  { %v1792_v58 = vpop.permute.xlu1 %1791 }
 0xd80   :  { %v3130_v53 = vpop.eup %3129 }
 0xd81   :  { %v1552_v54 = vsel %vm311_vm3, %v3130_v53, 0.0 }
 0xd82   :  { %v3132_v55 = vpop.eup %3131  ;;  %1553 = vadd.xlane.f32.xlu0 %v1552_v54 }
 0xd83   :  { %v1549_v56 = vsel %vm311_vm3, %v3132_v55, 0.0 }
 0xd84   :  { %1550 = vadd.xlane.f32.xlu1 %v1549_v56 }
 0xd95   :  { %1789 = vrot.lane.b32.xlu1 %v3513_v63, %s3186_s1 }
 0xd98   :  { %1711 = vrot.lane.b32.xlu0 %v3515_v34, %s3186_s1 }
 0xe0b   :  { %v1554_v59 = vpop.xlane.xlu0 %1553 }
 0xe0c   :  { %3133 = vrcp.f32 %v1554_v59 }
 0xe0d   :  { %v1551_v60 = vpop.xlane.xlu1 %1550 }
 0xe0e   :  { %3135 = vrcp.f32 %v1551_v60 }
 0xe0f   :  { %v1712_v9 = vpop.permute.xlu0 %1711 }
 0xe11   :  { %v1790_v8 = vpop.permute.xlu1 %1789 }
 0xe19   :  { %v3134_v0 = vpop.eup %3133 }
 0xe1a   :  { %v1558_v1 = vmul.f32 %v3134_v0, %v3130_v53  ;;  %v2753_v53 = vld [vmem:[%s3729_s5 + $0x1] ss:$0 sm:$0xff] }
 0xe1b   :  { %v3136_v4 = vpop.eup %3135 }
 0xe1c   :  { %3005 = vmatmul.mubr.msk.f32.vlgmr.msra.gmra.mxu1 %vm311_vm3, %v1558_v1  ;;  %v1557_v7 = vmul.f32 %v3136_v4, %v3132_v55 }
 0xe1d   :  { %3013 = vmatpush3.xpose.msk.msra.mxu1 %vm155_vm2, %v1792_v58  ;;  %3014 = vmatprep.mubr.msk.f32.mxu1 %vm3182_vm1, %v3181_v6 }
 0xe1e   :  { %3000 = vmatmul.mubr.msk.f32.vlgmr.msra.gmra.mxu0 %vm311_vm3, %v1557_v7  ;;  %3022 = vmatprep.subr.mxu1 %v3181_v6 }
 0xe1f   :  { %3008 = vmatpush3.xpose.msk.msra.mxu0 %vm155_vm2, %v1714_v57  ;;  %3009 = vmatprep.mubr.msk.f32.mxu0 %vm3182_vm1, %v3181_v6 }
 0xe20   :  { %3015 = vmatmul.mubr.msk.f32.vlgmr.msra.gmra.mxu1 %vm155_vm2, %v1790_v8  ;;  %3017 = vmatprep.subr.mxu0 %v3181_v6 }
 0xe21   :  { %3024 = vmatprep.mubr.msk.f32.mxu1 %vm3182_vm1, %v3181_v6 }
 0xe22   :  { %3010 = vmatmul.mubr.msk.f32.vlgmr.msra.gmra.mxu0 %vm155_vm2, %v1712_v9 }
 0xe23   :  { %3019 = vmatprep.mubr.msk.f32.mxu0 %vm3182_vm1, %v3181_v6 }
 0xedc   :  { %v1707_v12 = vpop.f32.mrf.mxu1 }
 0xede   :  { %v1631_v13 = vpop.f32.mrf.mxu0  ;;  %v3006_v11 = vpop.f32.mrf.mxu1 }
 0xee0   :  { %v3001_v14 = vpop.f32.mrf.mxu0  ;;  %v1863_v16 = vpop.f32.mrf.mxu1 }
 0xee1   :  { %v1868_v17 = vmul.f32 0.25, %v1863_v16 }
 0xee2   :  { %v1785_v18 = vpop.f32.mrf.mxu0  ;;  %v3016_v21 = vpop.f32.mrf.mxu1 }
 0xee3   :  { %v1867_v22 = vmul.f32 0.25, %v1785_v18  ;;  %v1870_v23 = vadd.f32 %v1868_v17, %v3333_v20  ;;  %v2757_v18 = vld [vmem:[%s3731_s7 + $0x30] sm:$0xff]  ;;  %v2756_v21 = vld [vmem:[%s3731_s7 + $0x28] sm:$0xff] }
 0xee4   :  { %v3011_v24 = vpop.f32.mrf.mxu0 }
 0xee5   :  { %v1874_v25 = vsel %vm311_vm3, %v1870_v23, -inf  ;;  %v1869_v26 = vadd.f32 %v1867_v22, %v3327_v15  ;;  %v2755_v22 = vld [vmem:[%s3731_s7 + $0x20] sm:$0xff] }
 0xee6   :  { %1875 = vmax.xlane.f32.xlu1 %v1874_v25 }
 0xee7   :  { %v1871_v27 = vsel %vm311_vm3, %v1869_v26, -inf }
 0xee8   :  { %1872 = vmax.xlane.f32.xlu0 %v1871_v27 }
 0xef7   :  { %1893 = vrot.lane.b32.xlu1 %v3515_v34, %s3187_s23 }
 0xf6f   :  { %v1876_v28 = vpop.xlane.xlu1 %1875 }
 0xf70   :  { %v1878_v31 = vsub.f32 %v1870_v23, %v1876_v28 }
 0xf71   :  { %v1873_v32 = vpop.xlane.xlu0 %1872 }
 0xf72   :  { %v1881_v33 = vmul.f32 1.442695, %v1878_v31  ;;  %v1877_v35 = vsub.f32 %v1869_v26, %v1873_v32  ;;  %v3622_v31 = vld [vmem:[%s3730_s6 + $0x4] sm:$0xf] }
 0xf73   :  { %v1894_v36 = vpop.permute.xlu1 %1893 }
 0xf74   :  { %3137 = vpow2.f32 %v1881_v33  ;;  %v1879_v20 = vmul.f32 1.442695, %v1877_v35  ;;  %3018 = vmatpush3.msra.mxu0 %v1894_v36  ;;  %v2250_v33 = vrot.slane %v3622_v31, %v1023_v62  ;;  %v2770_v62 = vld [vmem:[%s3733_s9 + $0x78] sm:$0xff] }
 0xf75   :  { %3027 = vmatprep.subr.mxu0 %v2735_v47 }
 0xf76   :  { %3139 = vpow2.f32 %v1879_v20 }
 0xf81   :  { %v3138_v37 = vpop.eup %3137 }
 0xf82   :  { %v1886_v15 = vsel %vm311_vm3, %v3138_v37, 0.0 }
 0xf83   :  { %v3140_v38 = vpop.eup %3139  ;;  %1887 = vadd.xlane.f32.xlu0 %v1886_v15  ;;  %v2256_v15 = vrot.slane %v3622_v31, %v1029_v3  ;;  %v2769_v3 = vld [vmem:[%s3733_s9 + $0x70] sm:$0xff] }
 0xf84   :  { %v1883_v39 = vsel %vm311_vm3, %v3140_v38, 0.0 }
 0xf87   :  { %1884 = vadd.xlane.f32.xlu0 %v1883_v39 }
 0xf9d   :  { %1969 = vrot.lane.b32.xlu0 %v3513_v63, %s3187_s23 }
0x100c   :  { %v1888_v34 = vpop.xlane.xlu0 %1887 }
0x100d   :  { %3141 = vrcp.f32 %v1888_v34 }
0x1010   :  { %v1885_v40 = vpop.xlane.xlu0 %1884 }
0x1011   :  { %3143 = vrcp.f32 %v1885_v40  ;;  %v2768_v40 = vld [vmem:[%s3733_s9 + $0x68] sm:$0xff] }
0x1014   :  { %v1970_v42 = vpop.permute.xlu0 %1969 }
0x1015   :  { %3023 = vmatpush3.msra.mxu1 %v1970_v42  ;;  %v2766_v42 = vld [vmem:[%s3733_s9 + $0x58] sm:$0xff] }
0x1016   :  { %3034 = vmatprep.subr.mxu1 %v2733_v41 }
0x101a   :  { %v3142_v43 = vpop.eup %3141 }
0x101b   :  { %v1892_v44 = vmul.f32 %v3142_v43, %v3138_v37  ;;  %v2765_v43 = vld [vmem:[%s3733_s9 + $0x50] sm:$0xff] }
0x101d   :  { %3025 = vmatmul.mubr.msk.f32.vlgmr.msra.gmra.mxu1 %vm311_vm3, %v1892_v44  ;;  %v2764_v44 = vld [vmem:[%s3733_s9 + $0x48] sm:$0xff] }
0x101e   :  { %v3144_v63 = vpop.eup %3143  ;;  %3035 = vmatpush3.msra.mxu1 %v2733_v41  ;;  %3038 = vmatprep.mubr.msk.f32.mxu1 %vm155_vm2, %v1631_v13  ;;  %v2767_v41 = vld [vmem:[%s3733_s9 + $0x60] sm:$0xff] }
0x101f   :  { %3036 = vmatprep.subr.mxu1 %v2732_v45  ;;  %v1891_v46 = vmul.f32 %v3144_v63, %v3140_v38  ;;  %v2760_v63 = vld [vmem:[%s3732_s8 + $0x1] ss:$0 sm:$0xff] }
0x1020   :  { %3037 = vmatpush3.msra.mxu1 %v2732_v45  ;;  %v2763_v45 = vld [vmem:[%s3733_s9 + $0x40] sm:$0xff] }
0x1021   :  { %3020 = vmatmul.mubr.msk.f32.vlgmr.msra.gmra.mxu0 %vm311_vm3, %v1891_v46  ;;  %3039 = vmatmul.mubr.msk.f32.vlgmr.msra.gmra.mxu1 %vm155_vm2, %v1707_v12 }
0x1022   :  { %3028 = vmatpush3.msra.mxu0 %v2735_v47  ;;  %3052 = vmatprep.subr.mxu1 %v2770_v62 }
0x1023   :  { %3029 = vmatprep.subr.mxu0 %v2734_v48  ;;  %3053 = vmatpush3.msra.mxu1 %v2770_v62 }
0x1024   :  { %3030 = vmatpush3.msra.mxu0 %v2734_v48  ;;  %3054 = vmatprep.subr.mxu1 %v2769_v3 }
0x1025   :  { %3055 = vmatpush3.msra.mxu1 %v2769_v3  ;;  %v2500_v3 = vrot.slane %v3622_v31, %v1270_v19  ;;  %v2601_v19 = vld [vmem:[%s3737_s13 + $0x10] sm:$0xff] }
0x1026   :  { %3056 = vmatprep.subr.mxu1 %v2768_v40 }
0x1027   :  { %3057 = vmatpush3.msra.mxu1 %v2768_v40 }
0x1028   :  { %3058 = vmatprep.subr.mxu1 %v2767_v41 }
0x1029   :  { %3059 = vmatpush3.msra.mxu1 %v2767_v41 }
0x102a   :  { %3060 = vmatprep.subr.mxu1 %v2766_v42 }
0x102b   :  { %3061 = vmatpush3.msra.mxu1 %v2766_v42  ;;  %v2506_v42 = vrot.slane %v3622_v31, %v1276_v10  ;;  %v2600_v10 = vld [vmem:[%s3737_s13 + $0x8] sm:$0xff]  ;;  %v2599_v31 = vld [vmem:[%s3737_s13] sm:$0xff]  ;;  %s3188_s13 = smov [#allocation2]  }
0x102c   :  { %3062 = vmatprep.subr.mxu1 %v2765_v43  ;;  %s2690_s4 = sshll.u32 %s3188_s13, 4  ;;  %s2691_s4 = int_to_ptr.vmem [resolvable:$true] %s2690_s4 }
0x102d   :  { %3063 = vmatpush3.msra.mxu1 %v2765_v43  ;;  %s3159_s5 = scalar_lea.vmem %s2691_s4, 32  ;;  %p3164_p1 = scmp.lt.s32.totalorder %s2691_s4, %s2691_s4 }
0x102e   :  { %3064 = vmatprep.subr.mxu1 %v2764_v44  ;;  %p3160_p0 = scmp.ne.s32.totalorder %s2691_s4, %s3159_s5  ;;  %p3165_p2 = scmp.lt.s32.totalorder %s3159_s5, %s3159_s5 }
0x102f   :  { %3065 = vmatpush3.msra.mxu1 %v2764_v44 }
0x1030   :  { %3066 = vmatprep.subr.mxu1 %v2763_v45  ;;  %p3166_p3 = por %p3165_p2, %p3164_p1 }
0x1031   :  { %3067 = vmatpush3.msra.mxu1 %v2763_v45 }
0x1032   :  { %p3167_p4 = pnand %p3166_p3, %p3160_p0 }
0x10dd   :  { %v2041_v49 = vpop.f32.mrf.mxu1 }
0x10df   :  { %v3026_v50 = vpop.f32.mrf.mxu1 }
0x10e1   :  { %v1965_v5 = vpop.f32.mrf.mxu0  ;;  %v3040_v51 = vpop.f32.mrf.mxu1 }
0x10e2   :  { %3031 = vmatprep.mubr.msk.f32.mxu0 %vm155_vm2, %v1965_v5 }
0x10e3   :  { %v3021_v2 = vpop.f32.mrf.mxu0  ;;  %3032 = vmatmul.mubr.msk.f32.vlgmr.msra.gmra.mxu0 %vm155_vm2, %v2041_v49  ;;  %v2198_v55 = vpop.f32.mrf.mxu1 }
0x11a3   :  { %v3033_v52 = vpop.f32.mrf.mxu0 }
0x11a4   :  { %v2204_v54 = vadd.f32 %v3040_v51, %v3033_v52 }
0x11a5   :  { %v2117_v56 = vpop.f32.mrf.mxu0 }
0x11a6   :  { %v2216_v57 = vadd.f32 %v2753_v53, %v2204_v54  ;;  %v2199_v58 = vadd.f32 %v2198_v55, %v2117_v56 }
0x11a8   :  { %v2215_v59 = vadd.f32 %v2753_v53, %v2199_v58  ;;  %v2220_v60 = vadd.f32 %v2216_v57, %v3502_v30 }
0x11aa   :  { %v2224_v0 = vsel %vm66_vm0, %v2220_v60, 0.0  ;;  %v2219_v1 = vadd.f32 %v2215_v59, %v3500_v29  ;;  %v2758_v29 = vld [vmem:[%s3731_s7 + $0x38] sm:$0xff] }
0x11ab   :  { %2225 = vadd.xlane.f32.xlu0 %v2224_v0  ;;  %3041 = vmatprep.subr.mxu0 %v2758_v29 }
0x11ac   :  { %v2221_v4 = vsel %vm66_vm0, %v2219_v1, 0.0  ;;  %3042 = vmatpush3.msra.mxu0 %v2758_v29 }
0x11ad   :  { %2222 = vadd.xlane.f32.xlu1 %v2221_v4  ;;  %3043 = vmatprep.subr.mxu0 %v2757_v18 }
0x11ae   :  { %3044 = vmatpush3.msra.mxu0 %v2757_v18 }
0x11af   :  { %3045 = vmatprep.subr.mxu0 %v2756_v21 }
0x11b0   :  { %3046 = vmatpush3.msra.mxu0 %v2756_v21 }
0x11b1   :  { %3047 = vmatprep.subr.mxu0 %v2755_v22 }
0x11b2   :  { %3048 = vmatpush3.msra.mxu0 %v2755_v22 }
0x11b3   :  { %3071 = vmatprep.subr.mxu0 %v3181_v6 }
0x1234   :  { %v2226_v7 = vpop.xlane.xlu0 %2225 }
0x1235   :  { %v2228_v8 = vmul.f32 0.03125, %v2226_v7 }
0x1236   :  { %v2223_v9 = vpop.xlane.xlu1 %2222 }
0x1237   :  { %v2230_v12 = vsub.f32 %v2220_v60, %v2228_v8  ;;  %v2227_v13 = vmul.f32 0.03125, %v2223_v9  ;;  %v2772_v9 = vld [vmem:[%s3734_s10 + $0x1] ss:$0 sm:$0xff] }
0x1239   :  { %v2229_v11 = vsub.f32 %v2219_v1, %v2227_v13  ;;  %v2232_v14 = vmul.f32 %v2230_v12, %v2230_v12 }
0x123b   :  { %v2236_v16 = vsel %vm66_vm0, %v2232_v14, 0.0  ;;  %v2231_v17 = vmul.f32 %v2229_v11, %v2229_v11 }
0x123c   :  { %2237 = vadd.xlane.f32.xlu0 %v2236_v16 }
0x123d   :  { %v2233_v30 = vsel %vm66_vm0, %v2231_v17, 0.0 }
0x123e   :  { %2234 = vadd.xlane.f32.xlu1 %v2233_v30 }
0x12c5   :  { %v2238_v23 = vpop.xlane.xlu0 %2237 }
0x12c6   :  { %v2240_v24 = vmul.f32 0.03125, %v2238_v23 }
0x12c7   :  { %v2235_v25 = vpop.xlane.xlu1 %2234 }
0x12c8   :  { %v2242_v26 = vadd.f32 1e-12, %v2240_v24  ;;  %v2239_v27 = vmul.f32 0.03125, %v2235_v25 }
0x12ca   :  { %3145 = vrsqrt.f32 %v2242_v26  ;;  %v2241_v28 = vadd.f32 1e-12, %v2239_v27 }
0x12cc   :  { %3147 = vrsqrt.f32 %v2241_v28 }
0x12d7   :  { %v3146_v32 = vpop.eup %3145 }
0x12d8   :  { %v2246_v35 = vmul.f32 %v3146_v32, %v2230_v12 }
0x12d9   :  { %v3148_v36 = vpop.eup %3147 }
0x12da   :  { %v2245_v20 = vmul.f32 %v3148_v36, %v2229_v11  ;;  %v2252_v37 = vmul.f32 %v2250_v33, %v2246_v35  ;;  %v2511_v35 = vld [vmem:[%s3735_s11 + $0x10] sm:$0xff]  ;;  %v2510_v36 = vld [vmem:[%s3735_s11 + $0x8] sm:$0xff] }
0x12dc   :  { %v2251_v38 = vmul.f32 %v2250_v33, %v2245_v20  ;;  %v2258_v34 = vadd.f32 %v2256_v15, %v2252_v37  ;;  %v2512_v33 = vld [vmem:[%s3735_s11 + $0x18] sm:$0xff]  ;;  %v2509_v20 = vld [vmem:[%s3735_s11] sm:$0xff] }
0x12de   :  { %v3630_v39 = vadd.f32 %v2256_v15, %v2251_v38 }
0x12e0   :  { %3049 = vmatprep.mubr.msk.f32.mxu0 %vm66_vm0, %v3630_v39 }
0x12e1   :  { %3050 = vmatmul.mubr.msk.f32.vlgmr.msra.gmra.mxu0 %vm66_vm0, %v2258_v34 }
0x12e2   :  { %3079 = vmatprep.mubr.msk.f32.mxu0 %vm3182_vm1, %v3181_v6  ;;  %3072 = vmatpush3.msra.mxu0 %v2512_v33 }
0x12e3   :  { %3073 = vmatprep.subr.mxu0 %v3181_v6 }
0x12e4   :  { %3074 = vmatpush3.msra.mxu0 %v2511_v35 }
0x12e5   :  { %3075 = vmatprep.subr.mxu0 %v3181_v6 }
0x12e6   :  { %3076 = vmatpush3.msra.mxu0 %v2510_v36 }
0x12e7   :  { %3077 = vmatprep.subr.mxu0 %v3181_v6 }
0x12e8   :  { %3078 = vmatpush3.msra.mxu0 %v2509_v20 }
0x12e9   :  { %3082 = vmatprep.subr.mxu0 %v3181_v6 }
0x13a1   :  { %v3051_v46 = vpop.f32.mrf.mxu0 }
0x13a2   :  { %v2350_v47 = vadd.f32 %v3051_v46, %v2760_v63 }
0x13a3   :  { %v2344_v48 = vpop.f32.mrf.mxu0 }
0x13a4   :  { %v2354_v49 = vmul.f32 %v2350_v47, %v2350_v47  ;;  %v2345_v50 = vadd.f32 %v2760_v63, %v2344_v48 }
0x13a6   :  { %v2356_v5 = vmul.f32 %v2354_v49, %v2350_v47  ;;  %v2353_v2 = vmul.f32 %v2345_v50, %v2345_v50 }
0x13a8   :  { %v2358_v51 = vmul.f32 0.044715, %v2356_v5  ;;  %v2355_v52 = vmul.f32 %v2353_v2, %v2345_v50  ;;  %v2775_v5 = vld [vmem:[%s3736_s12] ss:$0 sm:$0xff] }
0x13aa   :  { %v2360_v53 = vadd.f32 %v2358_v51, %v2350_v47  ;;  %v2357_v54 = vmul.f32 0.044715, %v2355_v52 }
0x13ac   :  { %v2362_v55 = vmul.f32 0.7978846, %v2360_v53  ;;  %v2359_v56 = vadd.f32 %v2357_v54, %v2345_v50  ;;  %v2777_v54 = vld [vmem:[%s3738_s14] ss:$0 sm:$0xff] }
0x13ae   :  { %3149 = vtanh.f32 %v2362_v55  ;;  %v2361_v57 = vmul.f32 0.7978846, %v2359_v56 }
0x13b0   :  { %3151 = vtanh.f32 %v2361_v57 }
0x13bb   :  { %v3150_v58 = vpop.eup %3149 }
0x13bc   :  { %v2366_v59 = vadd.f32 1.0, %v3150_v58 }
0x13bd   :  { %v3152_v60 = vpop.eup %3151 }
0x13be   :  { %v2365_v0 = vadd.f32 1.0, %v3152_v60  ;;  %v2368_v1 = vmul.f32 0.5, %v2366_v59 }
0x13c0   :  { %v2367_v4 = vmul.f32 0.5, %v2365_v0  ;;  %v2370_v8 = vmul.f32 %v2368_v1, %v2350_v47 }
0x13c2   :  { %v2369_v7 = vmul.f32 %v2367_v4, %v2345_v50 }
0x13c4   :  { %3068 = vmatprep.mubr.msk.f32.mxu1 %vm1158_vm4, %v2369_v7 }
0x13c5   :  { %3069 = vmatmul.mubr.msk.f32.vlgmr.msra.gmra.mxu1 %vm1158_vm4, %v2370_v8 }
0x1485   :  { %v3070_v12 = vpop.f32.mrf.mxu1 }
0x1486   :  { %v2466_v13 = vadd.f32 %v3070_v12, %v2772_v9 }
0x1487   :  { %v2460_v11 = vpop.f32.mrf.mxu1 }
0x1488   :  { %v2461_v14 = vadd.f32 %v2772_v9, %v2460_v11  ;;  %v2470_v16 = vadd.f32 %v2466_v13, %v2258_v34 }
0x148a   :  { %v2474_v17 = vsel %vm66_vm0, %v2470_v16, 0.0  ;;  %v2469_v30 = vadd.f32 %v2461_v14, %v3630_v39 }
0x148b   :  { %2475 = vadd.xlane.f32.xlu0 %v2474_v17 }
0x148c   :  { %v2471_v29 = vsel %vm66_vm0, %v2469_v30, 0.0 }
0x148d   :  { %2472 = vadd.xlane.f32.xlu1 %v2471_v29 }
0x1514   :  { %v2476_v18 = vpop.xlane.xlu0 %2475 }
0x1515   :  { %v2478_v21 = vmul.f32 0.03125, %v2476_v18 }
0x1516   :  { %v2473_v22 = vpop.xlane.xlu1 %2472 }
0x1517   :  { %v2480_v23 = vsub.f32 %v2470_v16, %v2478_v21  ;;  %v2477_v24 = vmul.f32 0.03125, %v2473_v22 }
0x1519   :  { %v2479_v25 = vsub.f32 %v2469_v30, %v2477_v24  ;;  %v2482_v26 = vmul.f32 %v2480_v23, %v2480_v23 }
0x151b   :  { %v2486_v27 = vsel %vm66_vm0, %v2482_v26, 0.0  ;;  %v2481_v28 = vmul.f32 %v2479_v25, %v2479_v25 }
0x151c   :  { %2487 = vadd.xlane.f32.xlu0 %v2486_v27 }
0x151d   :  { %v2483_v32 = vsel %vm66_vm0, %v2481_v28, 0.0 }
0x151e   :  { %2484 = vadd.xlane.f32.xlu1 %v2483_v32 }
0x15a5   :  { %v2488_v37 = vpop.xlane.xlu0 %2487 }
0x15a6   :  { %v2490_v15 = vmul.f32 0.03125, %v2488_v37 }
0x15a7   :  { %v2485_v38 = vpop.xlane.xlu1 %2484 }
0x15a8   :  { %v2492_v39 = vadd.f32 1e-12, %v2490_v15  ;;  %v2489_v34 = vmul.f32 0.03125, %v2485_v38 }
0x15aa   :  { %3153 = vrsqrt.f32 %v2492_v39  ;;  %v2491_v62 = vadd.f32 1e-12, %v2489_v34 }
0x15ac   :  { %3155 = vrsqrt.f32 %v2491_v62 }
0x15b7   :  { %v3154_v40 = vpop.eup %3153 }
0x15b8   :  { %v2496_v41 = vmul.f32 %v3154_v40, %v2480_v23 }
0x15b9   :  { %v3156_v43 = vpop.eup %3155 }
0x15ba   :  { %v2495_v44 = vmul.f32 %v3156_v43, %v2479_v25  ;;  %v2502_v45 = vmul.f32 %v2500_v3, %v2496_v41 }
0x15bc   :  { %v2501_v63 = vmul.f32 %v2500_v3, %v2495_v44  ;;  %v2508_v46 = vadd.f32 %v2506_v42, %v2502_v45 }
0x15be   :  { %v2507_v47 = vadd.f32 %v2506_v42, %v2501_v63  ;;  %v2523_v49 = vrot.slane %v2508_v46, 6 }
0x15c0   :  { %v2522_v48 = vrot.slane %v2507_v47, 7 }
0x15c2   :  { %v2525_v50 = vsel %vm2524_vm5, %v2523_v49, %v2522_v48 }
0x15c3   :  { %3080 = vmatmul.mubr.msk.f32.vlgmr.msra.gmra.mxu0 %vm66_vm0, %v2525_v50 }
0x15c4   :  { %3090 = vmatprep.mubr.msk.f32.mxu0 %vm3182_vm1, %v3181_v6  ;;  %3083 = vmatpush3.msra.mxu0 %v2602_v61 }
0x15c5   :  { %3084 = vmatprep.subr.mxu0 %v3181_v6 }
0x15c6   :  { %3085 = vmatpush3.msra.mxu0 %v2601_v19 }
0x15c7   :  { %3086 = vmatprep.subr.mxu0 %v3181_v6 }
0x15c8   :  { %3087 = vmatpush3.msra.mxu0 %v2600_v10 }
0x15c9   :  { %3088 = vmatprep.subr.mxu0 %v3181_v6 }
0x15ca   :  { %3089 = vmatpush3.msra.mxu0 %v2599_v31 }
0x1683   :  { %v2594_v2 = vpop.f32.mrf.mxu0 }
0x1684   :  { %v2595_v51 = vadd.f32 %v2775_v5, %v2594_v2 }
0x1685   :  { %v3081_v52 = vpop.f32.mrf.mxu0 }
0x1686   :  { %3157 = vtanh.f32 %v2595_v51 }
0x1693   :  { %v3158_v53 = vpop.eup %3157 }
0x1694   :  { %3091 = vmatmul.mubr.msk.f32.vlgmr.msra.gmra.mxu0 %vm66_vm0, %v3158_v53 }
0x1754   :  { %v2679_v55 = vpop.f32.mrf.mxu0 }
0x1755   :  { %v2680_v6 = vadd.f32 %v2777_v54, %v2679_v55 }
0x1756   :  { %v3092_v56 = vpop.f32.mrf.mxu0 }
0x1757   :  { %2683 = vst [vmem:[#allocation2] sm:$0x3] %v2680_v6 }
0x1758   :  { %3170 = shalt.err (!%p3167_p4)
}
0x1759   :  { %2693 = dma.vmem_to_hbm [thread:$0]  %s2691_s4, 32, %s3739_s15, [#allocation3]  }
0x175a   :  { %3179 = dma.done.wait [#allocation3], 32  }
0x175b   :  { %3180 = vsyncadd [#allocation3], 4294967264 }
0x175c   :  { %2697 = vsyncpa [#allocation3], 1 }

</bundles_post_ra>
